<compile_context>
chip_gen: v6e
topology: v6e:2x2x1
jax: 0.10.0
libtpu: 0.0.40
codegen_flags: <defaults>
</compile_context>

<pallas_src>
import math

import jax
import jax.numpy as jnp
from jax.experimental import pallas as pl
from jax.experimental.pallas import tpu as pltpu

LN_EPS = 1e-5  # nn.LayerNorm default
_INV_SQRT2 = 1.0 / math.sqrt(2.0)


def projection_head_kernel(x_ref, w1_ref, b1_ref, w2_ref, b2_ref,
                           gamma_ref, beta_ref, o_ref):
    # MXU operands stay in their native (possibly bf16) dtype; accumulate f32.
    x = x_ref[...]
    w1 = w1_ref[...]
    w2 = w2_ref[...]
    # Hoist the (1, P) parameter reads/broadcasts: read once, reuse.
    b1 = b1_ref[...].astype(jnp.float32)
    b2 = b2_ref[...].astype(jnp.float32)
    gamma = gamma_ref[...].astype(jnp.float32)
    beta = beta_ref[...].astype(jnp.float32)

    # projected = self.projection(x)
    projected = jnp.dot(x, w1, preferred_element_type=jnp.float32) + b1

    # x = self.gelu(projected)   (exact erf GELU == nn.GELU() default)
    g = 0.5 * projected * (1.0 + jax.lax.erf(projected * _INV_SQRT2))

    # x = self.fc(x)
    h = jnp.dot(g.astype(w2.dtype), w2, preferred_element_type=jnp.float32) + b2

    # x = self.dropout(x)  -> identity in eval mode (deterministic forward)
    # x = x + projected
    h = h + projected

    # x = self.layer_norm(x)  (normalize over last dim, affine, biased variance)
    mean = jnp.mean(h, axis=-1, keepdims=True)
    centered = h - mean
    var = jnp.mean(centered * centered, axis=-1, keepdims=True)
    y = centered * jax.lax.rsqrt(var + LN_EPS) * gamma + beta

    o_ref[...] = y.astype(o_ref.dtype)


def projection_head(x, w1, b1, w2, b2, gamma, beta, *,
                    block_batch=512, compute_dtype=None):
    """x: [B, E] -> [B, P].

    Batch is tiled into TB-row blocks (HBM<->VMEM double-buffered); weights use
    constant index_maps and stay resident in VMEM across grid steps.
    `compute_dtype` (e.g. jnp.bfloat16) casts only the MXU operands; output and
    elementwise math stay in the original / f32 precision.
    """
    B, E = x.shape
    P = w1.shape[1]
    out_dtype = x.dtype

    if compute_dtype is not None:
        x = x.astype(compute_dtype)
        w1 = w1.astype(compute_dtype)
        w2 = w2.astype(compute_dtype)

    assert block_batch % 8 == 0, "block_batch must be a multiple of 8"
    # TB == B (full dim) always satisfies layout rules; otherwise use a
    # multiple-of-8 tile (last grid block may be partial -> Pallas masks it).
    TB = B if B <= block_batch else block_batch
    grid = (pl.cdiv(B, TB),)

    x_bytes = jnp.dtype(x.dtype).itemsize
    o_bytes = jnp.dtype(out_dtype).itemsize
    w_bytes = jnp.dtype(w1.dtype).itemsize

    # Explicit VMEM budget (v7x: 64 MiB physical / 32 MiB scoped default):
    # x/out double buffers + (conservatively double-counted) resident params
    # + f32 live intermediates (projected, g, h, LayerNorm temps).
    vmem_est = (2 * TB * E * x_bytes
                + 2 * TB * P * o_bytes
                + 2 * ((E * P + P * P) * w_bytes + 4 * P * 4)
                + 6 * TB * P * 4)
    vmem_limit = int(min(max(2 * vmem_est, 16 * 1024 * 1024), 64 * 1024 * 1024))

    cost = pl.CostEstimate(
        flops=2 * B * P * (E + P) + 10 * B * P,
        transcendentals=B * P + B,          # erf per element + rsqrt per row
        bytes_accessed=(B * E * x_bytes + B * P * o_bytes
                        + (E * P + P * P) * w_bytes + 4 * P * 4),
    )

    w1_spec = pl.BlockSpec((E, P), lambda i: (0, 0))   # VMEM-resident
    w2_spec = pl.BlockSpec((P, P), lambda i: (0, 0))   # VMEM-resident
    vec_spec = pl.BlockSpec((1, P), lambda i: (0, 0))  # biases / gamma / beta

    return pl.pallas_call(
        projection_head_kernel,
        out_shape=jax.ShapeDtypeStruct((B, P), out_dtype),
        grid=grid,
        in_specs=[
            pl.BlockSpec((TB, E), lambda i: (i, 0)),   # x: tiled over batch
            w1_spec,
            vec_spec,                                  # b1
            w2_spec,
            vec_spec,                                  # b2
            vec_spec,                                  # gamma
            vec_spec,                                  # beta
        ],
        out_specs=pl.BlockSpec((TB, P), lambda i: (i, 0)),
        compiler_params=pltpu.CompilerParams(
            dimension_semantics=("parallel",),         # shard batch across TCs (v7x)
            vmem_limit_bytes=vmem_limit,
        ),
        cost_estimate=cost,
    )(x, w1, b1.reshape(1, P), w2, b2.reshape(1, P),
      gamma.reshape(1, P), beta.reshape(1, P))


def _reference(x, w1, b1, w2, b2, gamma, beta):
    projected = x @ w1 + b1
    g = jax.nn.gelu(projected, approximate=False)
    h = g @ w2 + b2
    h = h + projected
    mean = jnp.mean(h, axis=-1, keepdims=True)
    var = jnp.mean((h - mean) ** 2, axis=-1, keepdims=True)
    return (h - mean) * jax.lax.rsqrt(var + LN_EPS) * gamma + beta


if __name__ == "__main__":
    # Small but grid-exercising shapes: 4 batch tiles of 256 rows each.
    B, E, P = 1024, 64, 128
    TB = 256

    key = jax.random.PRNGKey(0)
    kx, k1, kb1, k2, kb2 = jax.random.split(key, 5)

    x = jax.random.normal(kx, (B, E), dtype=jnp.float32)

    # nn.Linear-style deterministic init: U(-1/sqrt(fan_in), 1/sqrt(fan_in))
    bound1 = 1.0 / math.sqrt(E)
    w1 = jax.random.uniform(k1, (E, P), jnp.float32, -bound1, bound1)
    b1 = jax.random.uniform(kb1, (P,), jnp.float32, -bound1, bound1)
    bound2 = 1.0 / math.sqrt(P)
    w2 = jax.random.uniform(k2, (P, P), jnp.float32, -bound2, bound2)
    b2 = jax.random.uniform(kb2, (P,), jnp.float32, -bound2, bound2)
    gamma = jnp.ones((P,), jnp.float32)
    beta = jnp.zeros((P,), jnp.float32)

    ref = _reference(x, w1, b1, w2, b2, gamma, beta)

    # f32 path: tight match vs reference.
    out = projection_head(x, w1, b1, w2, b2, gamma, beta, block_batch=TB)
    out = jax.block_until_ready(out)
    assert out.shape == (B, P)
    assert jnp.allclose(out, ref, atol=2e-5, rtol=2e-5), "f32 mismatch vs reference"

    # bf16-operand MXU fast path (f32 accumulation): loose tolerance.
    out_bf16 = projection_head(x, w1, b1, w2, b2, gamma, beta,
                               block_batch=TB, compute_dtype=jnp.bfloat16)
    out_bf16 = jax.block_until_ready(out_bf16)
    assert out_bf16.shape == (B, P)
    assert float(jnp.max(jnp.abs(out_bf16 - ref))) < 0.1, "bf16 path out of tolerance"

    print("KERNEL_OK")
</pallas_src>

<mosaic_0001>
module attributes {stable_mosaic.version = 11 : i64} {
  func.func @projection_head_kernel(%arg0: i32, %arg1: memref<256x64xf32, #tpu.memory_space<vmem>>, %arg2: memref<64x128xf32, #tpu.memory_space<vmem>>, %arg3: memref<1x128xf32, #tpu.memory_space<vmem>>, %arg4: memref<128x128xf32, #tpu.memory_space<vmem>>, %arg5: memref<1x128xf32, #tpu.memory_space<vmem>>, %arg6: memref<1x128xf32, #tpu.memory_space<vmem>>, %arg7: memref<1x128xf32, #tpu.memory_space<vmem>>, %arg8: memref<256x128xf32, #tpu.memory_space<vmem>>) attributes {dimension_semantics = [#tpu.dimension_semantics<parallel>], iteration_bounds = array<i64: 4>, scalar_prefetch = 0 : i64, scratch_operands = 0 : i64, tpu.core_type = #tpu.core_type<tc>, window_params = [{transform_indices = @transform_0, window_bounds = array<i64: 256, 64>}, {pipeline_mode = #tpu.pipeline_mode<synchronous>, transform_indices = @transform_1, window_bounds = array<i64: 64, 128>}, {pipeline_mode = #tpu.pipeline_mode<synchronous>, transform_indices = @transform_2, window_bounds = array<i64: 1, 128>}, {pipeline_mode = #tpu.pipeline_mode<synchronous>, transform_indices = @transform_3, window_bounds = array<i64: 128, 128>}, {pipeline_mode = #tpu.pipeline_mode<synchronous>, transform_indices = @transform_4, window_bounds = array<i64: 1, 128>}, {pipeline_mode = #tpu.pipeline_mode<synchronous>, transform_indices = @transform_5, window_bounds = array<i64: 1, 128>}, {pipeline_mode = #tpu.pipeline_mode<synchronous>, transform_indices = @transform_6, window_bounds = array<i64: 1, 128>}, {transform_indices = @transform_7, window_bounds = array<i64: 256, 128>}]} {
    %c0 = arith.constant 0 : index
    %c0_0 = arith.constant 0 : index
    %0 = vector.load %arg1[%c0, %c0_0] : memref<256x64xf32, #tpu.memory_space<vmem>>, vector<256x64xf32>
    %c0_1 = arith.constant 0 : index
    %c0_2 = arith.constant 0 : index
    %1 = vector.load %arg2[%c0_1, %c0_2] : memref<64x128xf32, #tpu.memory_space<vmem>>, vector<64x128xf32>
    %c0_3 = arith.constant 0 : index
    %c0_4 = arith.constant 0 : index
    %2 = vector.load %arg4[%c0_3, %c0_4] : memref<128x128xf32, #tpu.memory_space<vmem>>, vector<128x128xf32>
    %c0_5 = arith.constant 0 : index
    %c0_6 = arith.constant 0 : index
    %3 = vector.load %arg3[%c0_5, %c0_6] : memref<1x128xf32, #tpu.memory_space<vmem>>, vector<1x128xf32>
    %c0_7 = arith.constant 0 : index
    %c0_8 = arith.constant 0 : index
    %4 = vector.load %arg5[%c0_7, %c0_8] : memref<1x128xf32, #tpu.memory_space<vmem>>, vector<1x128xf32>
    %c0_9 = arith.constant 0 : index
    %c0_10 = arith.constant 0 : index
    %5 = vector.load %arg6[%c0_9, %c0_10] : memref<1x128xf32, #tpu.memory_space<vmem>>, vector<1x128xf32>
    %c0_11 = arith.constant 0 : index
    %c0_12 = arith.constant 0 : index
    %6 = vector.load %arg7[%c0_11, %c0_12] : memref<1x128xf32, #tpu.memory_space<vmem>>, vector<1x128xf32>
    %cst = arith.constant dense<0.000000e+00> : vector<256x128xf32>
    %7 = tpu.matmul %0, %1, %cst {dimension_numbers = #tpu.dot_dimension_numbers<[1], [0], [0], [1], [0, 0, 1, 1], [], []>} : vector<256x64xf32>, vector<64x128xf32>, vector<256x128xf32> -> vector<256x128xf32>
    %8 = vector.broadcast %3 : vector<1x128xf32> to vector<256x128xf32>
    %9 = arith.addf %7, %8 : vector<256x128xf32>
    %cst_13 = arith.constant 5.000000e-01 : f32
    %10 = vector.broadcast %cst_13 : f32 to vector<256x128xf32>
    %11 = arith.mulf %10, %9 : vector<256x128xf32>
    %cst_14 = arith.constant 0.707106769 : f32
    %12 = vector.broadcast %cst_14 : f32 to vector<256x128xf32>
    %13 = arith.mulf %9, %12 : vector<256x128xf32>
    %14 = math.erf %13 : vector<256x128xf32>
    %cst_15 = arith.constant 1.000000e+00 : f32
    %15 = vector.broadcast %cst_15 : f32 to vector<256x128xf32>
    %16 = arith.addf %15, %14 : vector<256x128xf32>
    %17 = arith.mulf %11, %16 : vector<256x128xf32>
    %cst_16 = arith.constant dense<0.000000e+00> : vector<256x128xf32>
    %18 = tpu.matmul %17, %2, %cst_16 {dimension_numbers = #tpu.dot_dimension_numbers<[1], [0], [0], [1], [0, 0, 1, 1], [], []>} : vector<256x128xf32>, vector<128x128xf32>, vector<256x128xf32> -> vector<256x128xf32>
    %19 = vector.broadcast %4 : vector<1x128xf32> to vector<256x128xf32>
    %20 = arith.addf %18, %19 : vector<256x128xf32>
    %21 = arith.addf %20, %9 : vector<256x128xf32>
    %cst_17 = arith.constant dense<0.000000e+00> : vector<256xf32>
    %22 = vector.multi_reduction <add>, %21, %cst_17 [1] : vector<256x128xf32> to vector<256xf32>
    %23 = vector.shape_cast %22 : vector<256xf32> to vector<256x1xf32>
    %cst_18 = arith.constant 1.280000e+02 : f32
    %24 = vector.broadcast %cst_18 : f32 to vector<256x1xf32>
    %25 = arith.divf %23, %24 : vector<256x1xf32>
    %26 = vector.broadcast %25 : vector<256x1xf32> to vector<256x128xf32>
    %27 = arith.subf %21, %26 : vector<256x128xf32>
    %28 = arith.mulf %27, %27 : vector<256x128xf32>
    %cst_19 = arith.constant dense<0.000000e+00> : vector<256xf32>
    %29 = vector.multi_reduction <add>, %28, %cst_19 [1] : vector<256x128xf32> to vector<256xf32>
    %30 = vector.shape_cast %29 : vector<256xf32> to vector<256x1xf32>
    %cst_20 = arith.constant 1.280000e+02 : f32
    %31 = vector.broadcast %cst_20 : f32 to vector<256x1xf32>
    %32 = arith.divf %30, %31 : vector<256x1xf32>
    %cst_21 = arith.constant 9.99999974E-6 : f32
    %33 = vector.broadcast %cst_21 : f32 to vector<256x1xf32>
    %34 = arith.addf %32, %33 : vector<256x1xf32>
    %35 = math.rsqrt %34 : vector<256x1xf32>
    %36 = vector.broadcast %35 : vector<256x1xf32> to vector<256x128xf32>
    %37 = arith.mulf %27, %36 : vector<256x128xf32>
    %38 = vector.broadcast %5 : vector<1x128xf32> to vector<256x128xf32>
    %39 = arith.mulf %37, %38 : vector<256x128xf32>
    %40 = vector.broadcast %6 : vector<1x128xf32> to vector<256x128xf32>
    %41 = arith.addf %39, %40 : vector<256x128xf32>
    %c0_22 = arith.constant 0 : index
    %c0_23 = arith.constant 0 : index
    %42 = vector.load %arg8[%c0_22, %c0_23] : memref<256x128xf32, #tpu.memory_space<vmem>>, vector<256x128xf32>
    tpu.vector_store %arg8[%c0_22, %c0_23], %41 {strides = array<i32>} : memref<256x128xf32, #tpu.memory_space<vmem>>, vector<256x128xf32>,
    return
  }
  func.func @transform_0(%arg0: i32) -> (i32, i32) {
    %c0_i32 = arith.constant 0 : i32
    %c0_i32_0 = arith.constant 0 : i32
    return %arg0, %c0_i32 : i32, i32
  }
  func.func @transform_1(%arg0: i32) -> (i32, i32) {
    %c0_i32 = arith.constant 0 : i32
    %c0_i32_0 = arith.constant 0 : i32
    %c0_i32_1 = arith.constant 0 : i32
    return %c0_i32, %c0_i32_0 : i32, i32
  }
  func.func @transform_2(%arg0: i32) -> (i32, i32) {
    %c0_i32 = arith.constant 0 : i32
    %c0_i32_0 = arith.constant 0 : i32
    %c0_i32_1 = arith.constant 0 : i32
    return %c0_i32, %c0_i32_0 : i32, i32
  }
  func.func @transform_3(%arg0: i32) -> (i32, i32) {
    %c0_i32 = arith.constant 0 : i32
    %c0_i32_0 = arith.constant 0 : i32
    %c0_i32_1 = arith.constant 0 : i32
    return %c0_i32, %c0_i32_0 : i32, i32
  }
  func.func @transform_4(%arg0: i32) -> (i32, i32) {
    %c0_i32 = arith.constant 0 : i32
    %c0_i32_0 = arith.constant 0 : i32
    %c0_i32_1 = arith.constant 0 : i32
    return %c0_i32, %c0_i32_0 : i32, i32
  }
  func.func @transform_5(%arg0: i32) -> (i32, i32) {
    %c0_i32 = arith.constant 0 : i32
    %c0_i32_0 = arith.constant 0 : i32
    %c0_i32_1 = arith.constant 0 : i32
    return %c0_i32, %c0_i32_0 : i32, i32
  }
  func.func @transform_6(%arg0: i32) -> (i32, i32) {
    %c0_i32 = arith.constant 0 : i32
    %c0_i32_0 = arith.constant 0 : i32
    %c0_i32_1 = arith.constant 0 : i32
    return %c0_i32, %c0_i32_0 : i32, i32
  }
  func.func @transform_7(%arg0: i32) -> (i32, i32) {
    %c0_i32 = arith.constant 0 : i32
    %c0_i32_0 = arith.constant 0 : i32
    return %arg0, %c0_i32 : i32, i32
  }
}

</mosaic_0001>

<bundles_post_ra>
// kernel: tpu_custom_call.1
= control target key start
LH: loop header
LB: loop body
LE: loop exit
PB: predicated region body
PF: predicated region fallthrough
CT: control target
= control target key end

     0   :  { %12 = vsyncpa [#allocation3], 0  ;;  %s3089_s0 = inlined_call_operand.vmem [shape: f32[1024,64], index: 0, kind: input, shape index: {}]   ;;  %s3090_s1 = inlined_call_operand.vmem [shape: f32[64,128], index: 1, kind: input, shape index: {}]   ;;  %s3091_s2 = inlined_call_operand.vmem [shape: f32[1,128], index: 2, kind: input, shape index: {}]   ;;  %s3092_s3 = inlined_call_operand.vmem [shape: f32[128,128], index: 3, kind: input, shape index: {}]   ;;  %s3093_s4 = inlined_call_operand.vmem [shape: f32[1,128], index: 4, kind: input, shape index: {}]   ;;  %s3094_s5 = inlined_call_operand.vmem [shape: f32[1,128], index: 5, kind: input, shape index: {}]   ;;  %s3095_s6 = inlined_call_operand.vmem [shape: f32[1,128], index: 6, kind: input, shape index: {}]   ;;  %s3096_s7 = inlined_call_operand.hbm [shape: f32[1024,128], index: 7, kind: output, shape index: {}]  }
   0x1   :  { %14 = vsyncpa [#allocation3 + $0x1], 0  ;;  %s2215_s24 = smov 0   ;;  %s2217_s25 = smov 0  }
   0x2   :  { %s2219_s26 = smov 0   ;;  %s2221_s27 = smov 0  }
   0x3 LB: > { %s2236_s28 = sadd.s32 4294967295, %s2170_s27   ;;  %s1628_s29 = sadd.s32 4294967294, %s2170_s27   ;;  %s2170_s27 = sphi %s2221_s27, %s3102_s27   ;;  %s2166_s26 = sphi %s2219_s26, %s3101_s26   ;;  %s2162_s25 = sphi %s2217_s25, %s3100_s25   ;;  %s2158_s24 = sphi %s2215_s24, %s3099_s24  }
   0x4   : > { %s2240_s30 = sadd.s32 1, %s2170_s27   ;;  %s179_s8 = sadd.s32 1, %s2166_s26 }
   0x5   : > { %s176_s9 = ssub.s32 %s2170_s27, %s2240_s30  ;;  %p189_p0 = scmp.ne.s32.totalorder %s2166_s26, %s2162_s25 }
   0x6   : > { %p177_p1 = scmp.eq.s32.totalorder %s176_s9, 0  ;;  %p190_p2 = scmp.eq.s32.totalorder %s2236_s28, 3 }
   0x7   : > { %p195_p3 = scmp.ne.s32.totalorder %s2162_s25, %s2158_s24  ;;  %p196_p4 = scmp.eq.s32.totalorder %s1628_s29, 3 }
   0x8   : > { %s2251_s10 = scalar_select %p177_p1, %s2166_s26, %s179_s8  }
   0x9   : > { %p2253_p5 = por %p190_p2, %p189_p0  ;;  %p2257_p6 = por %p196_p4, %p195_p3 }
   0xa   : > { %p1631_p7 = scmp.ge.s32.totalorder %s2170_s27, 1  ;;  %p241_p8 = scmp.lt.s32.totalorder %s2170_s27, 5 }
   0xc   : > { %p242_p9 = pnand %p1631_p7, %p241_p8 }
   0xd   : > { %s1633_s17 = sshll.u32 (!%p242_p9), %s2236_s28, 5  ;;  %s270_s15 = sand.u32 (!%p242_p9), 1, %s2162_s25  }
   0xe   : > { %245 = sbr.rel (%p242_p9) target bundleno = 836 (0x344), region = 48  ;;  %p274_p10 = scmp.lt.s32.totalorder (!%p242_p9), %s1633_s17, 127 }
   0xf   : > { %s1632_s20 = sshll.u32 (!%p242_p9), %s270_s15, 8  ;;  %s1676_s22 = sshll.u32 (!%p242_p9), %s2236_s28, 12 }
  0x10   : > { %s2913_s21 = scalar_lea.vmem (!%p242_p9), [#allocation2], %s1632_s20  ;;  %s3049_s28 = scalar_lea.sflag (!%p242_p9), [#allocation3], %s270_s15 }
  0x11   : > { %s1566_s23 = sshll.u32 (!%p242_p9), %s2913_s21, 4  ;;  %s2172_s14 = smov (!%p242_p9), [#allocation2]   ;;  %s3042_s23 = int_to_ptr.vmem [resolvable:$true] %s1566_s23 }
  0x12   : > { %s2110_s13 = scalar_lea.vmem (!%p242_p9), %s3042_s23, 4096  ;;  %s2114_s16 = sshll.u32 (!%p242_p9), %s2172_s14, 4  ;;  %s2115_s16 = int_to_ptr.vmem [resolvable:$false] %s2114_s16 }
  0x13   : > { %v319_v0 = vld [vmem:[%s3090_s1 + $0x38] sm:$0xff]  ;;  %v318_v1 = vld [vmem:[%s3090_s1 + $0x30] sm:$0xff]  ;;  %v317_v2 = vld [vmem:[%s3090_s1 + $0x28] sm:$0xff]  ;;  %s3104_s17 = smov (!%p274_p10, %s1633_s17), 127  ;;  %vm346_vm0 = vcmask 523264   ;;  %p2111_p11 = scmp.ne.s32.totalorder %s3042_s23, %s2110_s13 }
  0x14   : > { %1765 = vmatprep.subr.mxu0 %v319_v0  ;;  %v335_v3 = vld [vmem:[%s3092_s3 + $0x78] sm:$0xff]  ;;  %v316_v4 = vld [vmem:[%s3090_s1 + $0x20] sm:$0xff]  ;;  %v334_v5 = vld [vmem:[%s3092_s3 + $0x70] sm:$0xff]  ;;  %s1634_s9 = sshll.u32 %s3104_s17, 3  ;;  %s2116_s19 = scalar_lea.vmem %s2115_s16, 8192 }
  0x15   : > { %1766 = vmatpush3.msra.mxu0 %v319_v0  ;;  %1909 = vmatprep.subr.mxu1 %v335_v3  ;;  %v315_v6 = vld [vmem:[%s3090_s1 + $0x18] sm:$0xff]  ;;  %s2288_s18 = scalar_lea.vmem %s3089_s0, %s1634_s9  ;;  %v333_v7 = vld [vmem:[%s3092_s3 + $0x68] sm:$0xff]  ;;  %v314_v9 = vld [vmem:[%s3090_s1 + $0x10] sm:$0xff]  ;;  %s3040_s9 = scalar_lea.hbm %s3096_s7, %s1676_s22 }
  0x16   : > { %1767 = vmatprep.subr.mxu0 %v318_v1  ;;  %1925 = vmatpush3.msra.mxu1 %v335_v3  ;;  %v280_v8 = vld [vmem:[%s2288_s18] sm:$0xff]  ;;  %v313_v11 = vld [vmem:[%s3090_s1 + $0x8] sm:$0xff]  ;;  %v331_v12 = vld [vmem:[%s3092_s3 + $0x58] sm:$0xff]  ;;  %p2112_p12 = pnand %p2111_p11, %p2253_p5  ;;  %p2117_p0 = scmp.lt.s32.totalorder %s3042_s23, %s2115_s16 }
  0x17   : > { %1768 = vmatpush3.msra.mxu0 %v318_v1  ;;  %1910 = vmatprep.subr.mxu1 %v334_v5  ;;  %v332_v10 = vld [vmem:[%s3092_s3 + $0x60] sm:$0xff]  ;;  %v330_v14 = vld [vmem:[%s3092_s3 + $0x50] sm:$0xff]  ;;  %v281_v15 = vld [vmem:[%s2288_s18 + $0x8] sm:$0xff]  ;;  %p2118_p1 = scmp.lt.s32.totalorder %s2116_s19, %s2110_s13 }
  0x18   : > { %1769 = vmatprep.subr.mxu0 %v317_v2  ;;  %1926 = vmatpush3.msra.mxu1 %v334_v5  ;;  %v312_v13 = vld [vmem:[%s3090_s1] sm:$0xff]  ;;  %v282_v16 = vld [vmem:[%s2288_s18 + $0x10] sm:$0xff]  ;;  %v329_v17 = vld [vmem:[%s3092_s3 + $0x48] sm:$0xff]  ;;  %p2113_p13 = pneg %p2112_p12 }
  0x19   : > { %1770 = vmatpush3.msra.mxu0 %v317_v2  ;;  %1911 = vmatprep.subr.mxu1 %v333_v7  ;;  %v283_v18 = vld [vmem:[%s2288_s18 + $0x18] sm:$0xff]  ;;  %v284_v19 = vld [vmem:[%s2288_s18 + $0x20] sm:$0xff]  ;;  %v285_v21 = vld [vmem:[%s2288_s18 + $0x28] sm:$0xff]  ;;  %p2119_p2 = por %p2118_p1, %p2117_p0 }
  0x1a   : > { %1771 = vmatprep.subr.mxu0 %v316_v4  ;;  %1781 = vmatprep.mubr.msk.f32.mxu0 %vm346_vm0, %v280_v8  ;;  %v328_v20 = vld [vmem:[%s3092_s3 + $0x40] sm:$0xff]  ;;  %v286_v22 = vld [vmem:[%s2288_s18 + $0x30] sm:$0xff]  ;;  %v327_v23 = vld [vmem:[%s3092_s3 + $0x38] sm:$0xff] }
  0x1b   : > { %1772 = vmatpush3.msra.mxu0 %v316_v4  ;;  %1927 = vmatpush3.msra.mxu1 %v333_v7  ;;  %v287_v24 = vld [vmem:[%s2288_s18 + $0x38] sm:$0xff]  ;;  %v288_v25 = vld [vmem:[%s2288_s18 + $0x40] sm:$0xff]  ;;  %v326_v26 = vld [vmem:[%s3092_s3 + $0x30] sm:$0xff]  ;;  %p2120_p3 = pnand %p2119_p2, %p2113_p13 }
  0x1c   : > { %1773 = vmatprep.subr.mxu0 %v315_v6  ;;  %1912 = vmatprep.subr.mxu1 %v332_v10  ;;  %v289_v27 = vld [vmem:[%s2288_s18 + $0x48] sm:$0xff]  ;;  %v290_v28 = vld [vmem:[%s2288_s18 + $0x50] sm:$0xff]  ;;  %v291_v29 = vld [vmem:[%s2288_s18 + $0x58] sm:$0xff] }
  0x1d   : > { %1774 = vmatpush3.msra.mxu0 %v315_v6  ;;  %1928 = vmatpush3.msra.mxu1 %v332_v10  ;;  %v292_v30 = vld [vmem:[%s2288_s18 + $0x60] sm:$0xff]  ;;  %v293_v31 = vld [vmem:[%s2288_s18 + $0x68] sm:$0xff]  ;;  %v294_v32 = vld [vmem:[%s2288_s18 + $0x70] sm:$0xff] }
  0x1e   : > { %1775 = vmatprep.subr.mxu0 %v314_v9  ;;  %1913 = vmatprep.subr.mxu1 %v331_v12  ;;  %v295_v33 = vld [vmem:[%s2288_s18 + $0x78] sm:$0xff]  ;;  %v296_v34 = vld [vmem:[%s2288_s18 + $0x80] sm:$0xff]  ;;  %v297_v35 = vld [vmem:[%s2288_s18 + $0x88] sm:$0xff] }
  0x1f   : > { %1776 = vmatpush3.msra.mxu0 %v314_v9  ;;  %1929 = vmatpush3.msra.mxu1 %v331_v12  ;;  %v298_v36 = vld [vmem:[%s2288_s18 + $0x90] sm:$0xff]  ;;  %v299_v37 = vld [vmem:[%s2288_s18 + $0x98] sm:$0xff]  ;;  %v300_v38 = vld [vmem:[%s2288_s18 + $0xa0] sm:$0xff] }
  0x20   : > { %1777 = vmatprep.subr.mxu0 %v313_v11  ;;  %1914 = vmatprep.subr.mxu1 %v330_v14  ;;  %v301_v39 = vld [vmem:[%s2288_s18 + $0xa8] sm:$0xff]  ;;  %v302_v40 = vld [vmem:[%s2288_s18 + $0xb0] sm:$0xff]  ;;  %v303_v41 = vld [vmem:[%s2288_s18 + $0xb8] sm:$0xff] }
  0x21   : > { %1778 = vmatpush3.msra.mxu0 %v313_v11  ;;  %1930 = vmatpush3.msra.mxu1 %v330_v14  ;;  %v304_v42 = vld [vmem:[%s2288_s18 + $0xc0] sm:$0xff]  ;;  %v305_v43 = vld [vmem:[%s2288_s18 + $0xc8] sm:$0xff]  ;;  %v306_v44 = vld [vmem:[%s2288_s18 + $0xd0] sm:$0xff] }
  0x22   : > { %1779 = vmatprep.subr.mxu0 %v312_v13  ;;  %1915 = vmatprep.subr.mxu1 %v329_v17  ;;  %v307_v45 = vld [vmem:[%s2288_s18 + $0xd8] sm:$0xff]  ;;  %v308_v46 = vld [vmem:[%s2288_s18 + $0xe0] sm:$0xff]  ;;  %v309_v47 = vld [vmem:[%s2288_s18 + $0xe8] sm:$0xff] }
  0x23   : > { %1780 = vmatpush3.msra.mxu0 %v312_v13  ;;  %1931 = vmatpush3.msra.mxu1 %v329_v17  ;;  %v310_v48 = vld [vmem:[%s2288_s18 + $0xf0] sm:$0xff]  ;;  %v311_v49 = vld [vmem:[%s2288_s18 + $0xf8] sm:$0xff]  ;;  %v325_v50 = vld [vmem:[%s3092_s3 + $0x28] sm:$0xff] }
  0x24   : > { %1782 = vmatmul.mubr.msk.f32.vlgmr.msra.gmra.mxu0 %vm346_vm0, %v281_v15  ;;  %1829 = vmatprep.subr.mxu0 %v335_v3  ;;  %v324_v51 = vld [vmem:[%s3092_s3 + $0x20] sm:$0xff]  ;;  %v323_v52 = vld [vmem:[%s3092_s3 + $0x18] sm:$0xff]  ;;  %v322_v53 = vld [vmem:[%s3092_s3 + $0x10] sm:$0xff] }
  0x25   : > { %1784 = vmatprep.mubr.msk.f32.mxu0 %vm346_vm0, %v282_v16  ;;  %1830 = vmatpush3.msra.mxu0 %v335_v3  ;;  %v321_v54 = vld [vmem:[%s3092_s3 + $0x8] sm:$0xff]  ;;  %v320_v55 = vld [vmem:[%s3092_s3] sm:$0xff] }
  0x26   : > { %1831 = vmatprep.subr.mxu0 %v334_v5  ;;  %1916 = vmatprep.subr.mxu1 %v328_v20  ;;  %v2408_v56 = vld [vmem:[%s3091_s2] ss:$0 sm:$0xff] }
  0x27   : > { %1832 = vmatpush3.msra.mxu0 %v334_v5  ;;  %1932 = vmatpush3.msra.mxu1 %v328_v20 }
  0x28   : > { %1785 = vmatmul.mubr.msk.f32.gmra.mxu0 %vm346_vm0, %v283_v18  ;;  %1833 = vmatprep.subr.mxu0 %v333_v7 }
  0x29   : > { %1787 = vmatprep.mubr.msk.f32.mxu0 %vm346_vm0, %v284_v19  ;;  %1834 = vmatpush3.msra.mxu0 %v333_v7 }
  0x2a   : > { %1835 = vmatprep.subr.mxu0 %v332_v10  ;;  %1917 = vmatprep.subr.mxu1 %v327_v23 }
  0x2b   : > { %1836 = vmatpush3.msra.mxu0 %v332_v10  ;;  %1933 = vmatpush3.msra.mxu1 %v327_v23 }
  0x2c   : > { %1788 = vmatmul.mubr.msk.f32.gmra.mxu0 %vm346_vm0, %v285_v21  ;;  %1837 = vmatprep.subr.mxu0 %v331_v12 }
  0x2d   : > { %1790 = vmatprep.mubr.msk.f32.mxu0 %vm346_vm0, %v286_v22  ;;  %1838 = vmatpush3.msra.mxu0 %v331_v12 }
  0x2e   : > { %1839 = vmatprep.subr.mxu0 %v330_v14  ;;  %1918 = vmatprep.subr.mxu1 %v326_v26 }
  0x2f   : > { %1840 = vmatpush3.msra.mxu0 %v330_v14  ;;  %1934 = vmatpush3.msra.mxu1 %v326_v26 }
  0x30   : > { %1791 = vmatmul.mubr.msk.f32.gmra.mxu0 %vm346_vm0, %v287_v24  ;;  %1841 = vmatprep.subr.mxu0 %v329_v17 }
  0x31   : > { %1793 = vmatprep.mubr.msk.f32.mxu0 %vm346_vm0, %v288_v25  ;;  %1842 = vmatpush3.msra.mxu0 %v329_v17 }
  0x32   : > { %1843 = vmatprep.subr.mxu0 %v328_v20  ;;  %1919 = vmatprep.subr.mxu1 %v325_v50 }
  0x33   : > { %1844 = vmatpush3.msra.mxu0 %v328_v20  ;;  %1935 = vmatpush3.msra.mxu1 %v325_v50 }
  0x34   : > { %1794 = vmatmul.mubr.msk.f32.gmra.mxu0 %vm346_vm0, %v289_v27  ;;  %1845 = vmatprep.subr.mxu0 %v327_v23 }
  0x35   : > { %1796 = vmatprep.mubr.msk.f32.mxu0 %vm346_vm0, %v290_v28  ;;  %1846 = vmatpush3.msra.mxu0 %v327_v23 }
  0x36   : > { %1847 = vmatprep.subr.mxu0 %v326_v26  ;;  %1920 = vmatprep.subr.mxu1 %v324_v51 }
  0x37   : > { %1848 = vmatpush3.msra.mxu0 %v326_v26  ;;  %1936 = vmatpush3.msra.mxu1 %v324_v51 }
  0x38   : > { %1797 = vmatmul.mubr.msk.f32.gmra.mxu0 %vm346_vm0, %v291_v29  ;;  %1849 = vmatprep.subr.mxu0 %v325_v50 }
  0x39   : > { %1799 = vmatprep.mubr.msk.f32.mxu0 %vm346_vm0, %v292_v30  ;;  %1850 = vmatpush3.msra.mxu0 %v325_v50 }
  0x3a   : > { %1851 = vmatprep.subr.mxu0 %v324_v51  ;;  %1921 = vmatprep.subr.mxu1 %v323_v52 }
  0x3b   : > { %1852 = vmatpush3.msra.mxu0 %v324_v51  ;;  %1937 = vmatpush3.msra.mxu1 %v323_v52 }
  0x3c   : > { %1800 = vmatmul.mubr.msk.f32.gmra.mxu0 %vm346_vm0, %v293_v31  ;;  %1853 = vmatprep.subr.mxu0 %v323_v52 }
  0x3d   : > { %1802 = vmatprep.mubr.msk.f32.mxu0 %vm346_vm0, %v294_v32  ;;  %1854 = vmatpush3.msra.mxu0 %v323_v52 }
  0x3e   : > { %1855 = vmatprep.subr.mxu0 %v322_v53  ;;  %1922 = vmatprep.subr.mxu1 %v322_v53 }
  0x3f   : > { %1856 = vmatpush3.msra.mxu0 %v322_v53  ;;  %1938 = vmatpush3.msra.mxu1 %v322_v53 }
  0x40   : > { %1803 = vmatmul.mubr.msk.f32.gmra.mxu0 %vm346_vm0, %v295_v33  ;;  %1857 = vmatprep.subr.mxu0 %v321_v54 }
  0x41   : > { %1805 = vmatprep.mubr.msk.f32.mxu0 %vm346_vm0, %v296_v34  ;;  %1923 = vmatprep.subr.mxu1 %v321_v54 }
  0x42   : > { %1858 = vmatpush3.msra.mxu0 %v321_v54  ;;  %1939 = vmatpush3.msra.mxu1 %v321_v54 }
  0x43   : > { %1859 = vmatprep.subr.mxu0 %v320_v55  ;;  %1924 = vmatprep.subr.mxu1 %v320_v55 }
  0x44   : > { %1806 = vmatmul.mubr.msk.f32.gmra.mxu0 %vm346_vm0, %v297_v35  ;;  %1940 = vmatpush3.msra.mxu1 %v320_v55 }
  0x45   : > { %1808 = vmatprep.mubr.msk.f32.mxu0 %vm346_vm0, %v298_v36  ;;  %1860 = vmatpush3.msra.mxu0 %v320_v55 }
  0x48   : > { %1809 = vmatmul.mubr.msk.f32.gmra.mxu0 %vm346_vm0, %v299_v37 }
  0x49   : > { %1811 = vmatprep.mubr.msk.f32.mxu0 %vm346_vm0, %v300_v38 }
  0x4c   : > { %1812 = vmatmul.mubr.msk.f32.gmra.mxu0 %vm346_vm0, %v301_v39 }
  0x4d   : > { %1814 = vmatprep.mubr.msk.f32.mxu0 %vm346_vm0, %v302_v40 }
  0x50   : > { %1815 = vmatmul.mubr.msk.f32.gmra.mxu0 %vm346_vm0, %v303_v41 }
  0x51   : > { %1817 = vmatprep.mubr.msk.f32.mxu0 %vm346_vm0, %v304_v42 }
  0x54   : > { %1818 = vmatmul.mubr.msk.f32.gmra.mxu0 %vm346_vm0, %v305_v43 }
  0x55   : > { %1820 = vmatprep.mubr.msk.f32.mxu0 %vm346_vm0, %v306_v44 }
  0x58   : > { %1821 = vmatmul.mubr.msk.f32.gmra.mxu0 %vm346_vm0, %v307_v45 }
  0x59   : > { %1823 = vmatprep.mubr.msk.f32.mxu0 %vm346_vm0, %v308_v46 }
  0x5c   : > { %1824 = vmatmul.mubr.msk.f32.gmra.mxu0 %vm346_vm0, %v309_v47 }
  0x5d   : > { %1826 = vmatprep.mubr.msk.f32.mxu0 %vm346_vm0, %v310_v48 }
  0x60   : > { %1827 = vmatmul.mubr.msk.f32.gmra.mxu0 %vm346_vm0, %v311_v49 }
  0xe4   : > { %v1783_v57 = vpop.f32.mrf.mxu0 }
  0xe5   : > { %v2411_v58 = vadd.f32 %v1783_v57, %v2408_v56 }
  0xe6   : > { %v509_v59 = vpop.f32.mrf.mxu0 }
  0xe7   : > { %v701_v60 = vmul.f32 0.70710677, %v2411_v58  ;;  %v2415_v61 = vadd.f32 %v2408_v56, %v509_v59  ;;  %v669_v30 = vmul.f32 0.5, %v2411_v58 }
  0xe8   : > { %v1786_v62 = vpop.f32.mrf.mxu0 }
  0xe9   : > { %1982 = verf.f32 %v701_v60  ;;  %v700_v63 = vmul.f32 0.70710677, %v2415_v61  ;;  %v2419_v0 = vadd.f32 %v1786_v62, %v2408_v56  ;;  %v668_v26 = vmul.f32 0.5, %v2415_v61 }
  0xea   : > { %v519_v1 = vpop.f32.mrf.mxu0 }
  0xeb   : > { %1984 = verf.f32 %v700_v63  ;;  %v703_v2 = vmul.f32 0.70710677, %v2419_v0  ;;  %v2423_v3 = vadd.f32 %v2408_v56, %v519_v1  ;;  %v671_v46 = vmul.f32 0.5, %v2419_v0 }
  0xec   : > { %v1789_v4 = vpop.f32.mrf.mxu0 }
  0xed   : > { %1986 = verf.f32 %v703_v2  ;;  %v702_v5 = vmul.f32 0.70710677, %v2423_v3  ;;  %v2427_v6 = vadd.f32 %v1789_v4, %v2408_v56  ;;  %v670_v43 = vmul.f32 0.5, %v2423_v3 }
  0xee   : > { %v529_v7 = vpop.f32.mrf.mxu0 }
  0xef   : > { %1988 = verf.f32 %v702_v5  ;;  %v705_v8 = vmul.f32 0.70710677, %v2427_v6  ;;  %v2431_v9 = vadd.f32 %v2408_v56, %v529_v7  ;;  %v673_v59 = vmul.f32 0.5, %v2427_v6 }
  0xf0   : > { %v1792_v10 = vpop.f32.mrf.mxu0 }
  0xf1   : > { %1990 = verf.f32 %v705_v8  ;;  %v704_v11 = vmul.f32 0.70710677, %v2431_v9  ;;  %v2435_v12 = vadd.f32 %v1792_v10, %v2408_v56  ;;  %v672_v62 = vmul.f32 0.5, %v2431_v9 }
  0xf2   : > { %v539_v13 = vpop.f32.mrf.mxu0 }
  0xf3   : > { %v707_v14 = vmul.f32 0.70710677, %v2435_v12  ;;  %v2439_v15 = vadd.f32 %v2408_v56, %v539_v13  ;;  %1992 = verf.f32 %v704_v11 }
  0xf4   : > { %v1795_v16 = vpop.f32.mrf.mxu0 }
  0xf5   : > { %1994 = verf.f32 %v707_v14  ;;  %v706_v17 = vmul.f32 0.70710677, %v2439_v15  ;;  %v2443_v18 = vadd.f32 %v1795_v16, %v2408_v56  ;;  %v674_v16 = vmul.f32 0.5, %v2439_v15 }
  0xf6   : > { %v1983_v19 = vpop.eup %1982  ;;  %v549_v20 = vpop.f32.mrf.mxu0 }
  0xf7   : > { %1996 = verf.f32 %v706_v17  ;;  %v709_v21 = vmul.f32 0.70710677, %v2443_v18  ;;  %v765_v23 = vadd.f32 1.0, %v1983_v19  ;;  %v2447_v24 = vadd.f32 %v2408_v56, %v549_v20 }
  0xf8   : > { %v1985_v22 = vpop.eup %1984  ;;  %v1798_v25 = vpop.f32.mrf.mxu0  ;;  %v675_v20 = vmul.f32 0.5, %v2435_v12 }
  0xf9   : > { %1998 = verf.f32 %v709_v21  ;;  %v2451_v27 = vadd.f32 %v1798_v25, %v2408_v56  ;;  %v764_v28 = vadd.f32 1.0, %v1985_v22  ;;  %v708_v31 = vmul.f32 0.70710677, %v2447_v24 }
  0xfa   : > { %v1987_v29 = vpop.eup %1986  ;;  %v559_v32 = vpop.f32.mrf.mxu0  ;;  %v797_v37 = vmul.f32 %v765_v23, %v669_v30 }
  0xfb   : > { %v711_v33 = vmul.f32 0.70710677, %v2451_v27  ;;  %v2457_v34 = vadd.f32 %v2408_v56, %v559_v32  ;;  %v796_v35 = vmul.f32 %v764_v28, %v668_v26  ;;  %2000 = verf.f32 %v708_v31 }
  0xfc   : > { %v1989_v36 = vpop.eup %1988  ;;  %v1801_v38 = vpop.f32.mrf.mxu0  ;;  %v767_v41 = vadd.f32 1.0, %v1987_v29 }
  0xfd   : > { %2002 = verf.f32 %v711_v33  ;;  %v710_v39 = vmul.f32 0.70710677, %v2457_v34  ;;  %v2461_v40 = vadd.f32 %v1801_v38, %v2408_v56  ;;  %1861 = vmatprep.mubr.f32.mxu0 %v796_v35  ;;  %v766_v45 = vadd.f32 1.0, %v1989_v36 }
  0xfe   : > { %v1991_v42 = vpop.eup %1990  ;;  %v569_v44 = vpop.f32.mrf.mxu0  ;;  %1862 = vmatmul.mubr.f32.vlgmr.msra.gmra.mxu0 %v797_v37  ;;  %v799_v55 = vmul.f32 %v767_v41, %v671_v46  ;;  %v677_v33 = vmul.f32 0.5, %v2443_v18  ;;  %v676_v35 = vmul.f32 0.5, %v2447_v24 }
  0xff   : > { %2004 = verf.f32 %v710_v39  ;;  %v713_v47 = vmul.f32 0.70710677, %v2461_v40  ;;  %v2467_v48 = vadd.f32 %v2408_v56, %v569_v44  ;;  %v798_v51 = vmul.f32 %v766_v45, %v670_v43 }
 0x100   : > { %v1993_v49 = vpop.eup %1992  ;;  %v1804_v50 = vpop.f32.mrf.mxu0  ;;  %v769_v52 = vadd.f32 1.0, %v1991_v42 }
 0x101   : > { %2006 = verf.f32 %v713_v47  ;;  %v712_v53 = vmul.f32 0.70710677, %v2467_v48  ;;  %v2471_v54 = vadd.f32 %v1804_v50, %v2408_v56  ;;  %1864 = vmatprep.mubr.f32.mxu0 %v798_v51  ;;  %v768_v63 = vadd.f32 1.0, %v1993_v49 }
 0x102   : > { %v1995_v57 = vpop.eup %1994  ;;  %v579_v60 = vpop.f32.mrf.mxu0  ;;  %1865 = vmatmul.mubr.f32.gmra.mxu0 %v799_v55  ;;  %v801_v8 = vmul.f32 %v769_v52, %v673_v59  ;;  %v678_v50 = vmul.f32 0.5, %v2457_v34 }
 0x103   : > { %2008 = verf.f32 %v712_v53  ;;  %v715_v1 = vmul.f32 0.70710677, %v2471_v54  ;;  %v2477_v2 = vadd.f32 %v2408_v56, %v579_v60  ;;  %v800_v7 = vmul.f32 %v768_v63, %v672_v62 }
 0x104   : > { %v1997_v4 = vpop.eup %1996  ;;  %v1807_v5 = vpop.f32.mrf.mxu0  ;;  %v771_v13 = vadd.f32 1.0, %v1995_v57  ;;  %v679_v53 = vmul.f32 0.5, %v2451_v27 }
 0x105   : > { %2010 = verf.f32 %v715_v1  ;;  %v714_v10 = vmul.f32 0.70710677, %v2477_v2  ;;  %v2481_v11 = vadd.f32 %v1807_v5, %v2408_v56  ;;  %1867 = vmatprep.mubr.f32.mxu1 %v800_v7  ;;  %v770_v19 = vadd.f32 1.0, %v1997_v4 }
 0x106   : > { %v1999_v14 = vpop.eup %1998  ;;  %v589_v17 = vpop.f32.mrf.mxu0  ;;  %1868 = vmatmul.mubr.f32.vlgmr.msra.gmra.mxu1 %v801_v8  ;;  %v803_v31 = vmul.f32 %v771_v13, %v675_v20  ;;  %v681_v8 = vmul.f32 0.5, %v2461_v40 }
 0x107   : > { %2012 = verf.f32 %v714_v10  ;;  %v717_v21 = vmul.f32 0.70710677, %v2481_v11  ;;  %v2487_v22 = vadd.f32 %v2408_v56, %v589_v17  ;;  %v802_v25 = vmul.f32 %v770_v19, %v674_v16 }
 0x108   : > { %v1810_v23 = vpop.f32.mrf.mxu0  ;;  %v773_v26 = vadd.f32 1.0, %v1999_v14  ;;  %v2001_v28 = vpop.eup %2000  ;;  %v680_v10 = vmul.f32 0.5, %v2467_v48 }
 0x109   : > { %2014 = verf.f32 %v717_v21  ;;  %v716_v29 = vmul.f32 0.70710677, %v2487_v22  ;;  %v2491_v30 = vadd.f32 %v1810_v23, %v2408_v56  ;;  %1870 = vmatprep.mubr.f32.mxu1 %v802_v25  ;;  %v772_v37 = vadd.f32 1.0, %v2001_v28 }
 0x10a   : > { %v2003_v32 = vpop.eup %2002  ;;  %v599_v36 = vpop.f32.mrf.mxu0  ;;  %1871 = vmatmul.mubr.f32.gmra.mxu1 %v803_v31  ;;  %v805_v44 = vmul.f32 %v773_v26, %v677_v33  ;;  %v682_v31 = vmul.f32 0.5, %v2477_v2 }
 0x10b   : > { %2016 = verf.f32 %v716_v29  ;;  %v719_v38 = vmul.f32 0.70710677, %v2491_v30  ;;  %v2497_v39 = vadd.f32 %v2408_v56, %v599_v36  ;;  %v804_v43 = vmul.f32 %v772_v37, %v676_v35 }
 0x10c   : > { %v2005_v41 = vpop.eup %2004  ;;  %v1813_v42 = vpop.f32.mrf.mxu0  ;;  %v775_v47 = vadd.f32 1.0, %v2003_v32  ;;  %v683_v35 = vmul.f32 0.5, %v2471_v54 }
 0x10d   : > { %2018 = verf.f32 %v719_v38  ;;  %v718_v45 = vmul.f32 0.70710677, %v2497_v39  ;;  %v2501_v46 = vadd.f32 %v1813_v42, %v2408_v56  ;;  %1873 = vmatprep.mubr.f32.mxu1 %v804_v43  ;;  %v774_v52 = vadd.f32 1.0, %v2005_v41 }
 0x10e   : > { %v2007_v49 = vpop.eup %2006  ;;  %v609_v51 = vpop.f32.mrf.mxu0  ;;  %1874 = vmatmul.mubr.f32.gmra.mxu1 %v805_v44  ;;  %v807_v5 = vmul.f32 %v775_v47, %v679_v53 }
 0x10f   : > { %2020 = verf.f32 %v718_v45  ;;  %v721_v55 = vmul.f32 0.70710677, %v2501_v46  ;;  %v2507_v57 = vadd.f32 %v2408_v56, %v609_v51  ;;  %v806_v62 = vmul.f32 %v774_v52, %v678_v50 }
 0x110   : > { %v2009_v59 = vpop.eup %2008  ;;  %v1816_v60 = vpop.f32.mrf.mxu0  ;;  %v777_v63 = vadd.f32 1.0, %v2007_v49  ;;  %v685_v50 = vmul.f32 0.5, %v2481_v11  ;;  %v684_v51 = vmul.f32 0.5, %v2487_v22 }
 0x111   : > { %2022 = verf.f32 %v721_v55  ;;  %v720_v1 = vmul.f32 0.70710677, %v2507_v57  ;;  %v2511_v4 = vadd.f32 %v1816_v60, %v2408_v56  ;;  %1876 = vmatprep.mubr.f32.mxu1 %v806_v62  ;;  %v776_v14 = vadd.f32 1.0, %v2009_v59 }
 0x112   : > { %v2011_v7 = vpop.eup %2010  ;;  %v619_v13 = vpop.f32.mrf.mxu0  ;;  %1877 = vmatmul.mubr.f32.gmra.mxu1 %v807_v5  ;;  %v809_v23 = vmul.f32 %v777_v63, %v681_v8 }
 0x113   : > { %2024 = verf.f32 %v720_v1  ;;  %v723_v16 = vmul.f32 0.70710677, %v2511_v4  ;;  %v2517_v17 = vadd.f32 %v2408_v56, %v619_v13  ;;  %v808_v21 = vmul.f32 %v776_v14, %v680_v10 }
 0x114   : > { %v2013_v19 = vpop.eup %2012  ;;  %v1819_v20 = vpop.f32.mrf.mxu0  ;;  %v779_v28 = vadd.f32 1.0, %v2011_v7  ;;  %v686_v13 = vmul.f32 0.5, %v2497_v39 }
 0x115   : > { %2026 = verf.f32 %v723_v16  ;;  %v722_v25 = vmul.f32 0.70710677, %v2517_v17  ;;  %v2521_v26 = vadd.f32 %v1819_v20, %v2408_v56  ;;  %1879 = vmatprep.mubr.f32.mxu1 %v808_v21  ;;  %v778_v33 = vadd.f32 1.0, %v2013_v19 }
 0x116   : > { %v2015_v29 = vpop.eup %2014  ;;  %v629_v32 = vpop.f32.mrf.mxu0  ;;  %1880 = vmatmul.mubr.f32.gmra.mxu1 %v809_v23  ;;  %v811_v47 = vmul.f32 %v779_v28, %v683_v35  ;;  %v687_v19 = vmul.f32 0.5, %v2491_v30 }
 0x117   : > { %2028 = verf.f32 %v722_v25  ;;  %v725_v36 = vmul.f32 0.70710677, %v2521_v26  ;;  %v2527_v37 = vadd.f32 %v2408_v56, %v629_v32  ;;  %v810_v42 = vmul.f32 %v778_v33, %v682_v31 }
 0x118   : > { %v2017_v38 = vpop.eup %2016  ;;  %v1822_v41 = vpop.f32.mrf.mxu0  ;;  %v781_v43 = vadd.f32 1.0, %v2015_v29 }
 0x119   : > { %2030 = verf.f32 %v725_v36  ;;  %v724_v44 = vmul.f32 0.70710677, %v2527_v37  ;;  %v2531_v45 = vadd.f32 %v1822_v41, %v2408_v56  ;;  %1882 = vmatprep.mubr.f32.mxu1 %v810_v42  ;;  %v780_v53 = vadd.f32 1.0, %v2017_v38 }
 0x11a   : > { %v2019_v49 = vpop.eup %2018  ;;  %v639_v52 = vpop.f32.mrf.mxu0  ;;  %1883 = vmatmul.mubr.f32.gmra.mxu1 %v811_v47  ;;  %v813_v1 = vmul.f32 %v781_v43, %v685_v50  ;;  %v689_v36 = vmul.f32 0.5, %v2501_v46  ;;  %v688_v38 = vmul.f32 0.5, %v2507_v57 }
 0x11b   : > { %2032 = verf.f32 %v724_v44  ;;  %v727_v55 = vmul.f32 0.70710677, %v2531_v45  ;;  %v2537_v59 = vadd.f32 %v2408_v56, %v639_v52  ;;  %v812_v63 = vmul.f32 %v780_v53, %v684_v51 }
 0x11c   : > { %v2021_v60 = vpop.eup %2020  ;;  %v1825_v62 = vpop.f32.mrf.mxu0  ;;  %v783_v8 = vadd.f32 1.0, %v2019_v49  ;;  %v690_v49 = vmul.f32 0.5, %v2517_v17 }
 0x11d   : > { %2034 = verf.f32 %v727_v55  ;;  %v726_v5 = vmul.f32 0.70710677, %v2537_v59  ;;  %v2541_v7 = vadd.f32 %v1825_v62, %v2408_v56  ;;  %1885 = vmatprep.mubr.f32.mxu1 %v812_v63  ;;  %v782_v16 = vadd.f32 1.0, %v2021_v60 }
 0x11e   : > { %v2023_v10 = vpop.eup %2022  ;;  %v649_v14 = vpop.f32.mrf.mxu0  ;;  %1886 = vmatmul.mubr.f32.gmra.mxu1 %v813_v1  ;;  %v815_v33 = vmul.f32 %v783_v8, %v687_v19  ;;  %v691_v62 = vmul.f32 0.5, %v2511_v4  ;;  %v692_v1 = vmul.f32 0.5, %v2527_v37 }
 0x11f   : > { %2036 = verf.f32 %v726_v5  ;;  %v729_v20 = vmul.f32 0.70710677, %v2541_v7  ;;  %v2547_v21 = vadd.f32 %v2408_v56, %v649_v14  ;;  %v814_v28 = vmul.f32 %v782_v16, %v686_v13 }
 0x120   : > { %v2025_v23 = vpop.eup %2024  ;;  %v1828_v25 = vpop.f32.mrf.mxu0  ;;  %v785_v29 = vadd.f32 1.0, %v2023_v10  ;;  %v693_v14 = vmul.f32 0.5, %v2521_v26 }
 0x121   : > { %2038 = verf.f32 %v729_v20  ;;  %v728_v31 = vmul.f32 0.70710677, %v2547_v21  ;;  %v2551_v32 = vadd.f32 %v1828_v25, %v2408_v56  ;;  %1888 = vmatprep.mubr.f32.mxu1 %v814_v28  ;;  %v784_v42 = vadd.f32 1.0, %v2025_v23 }
 0x122   : > { %v2027_v35 = vpop.eup %2026  ;;  %v659_v41 = vpop.f32.mrf.mxu0  ;;  %1889 = vmatmul.mubr.f32.gmra.mxu1 %v815_v33  ;;  %v817_v51 = vmul.f32 %v785_v29, %v689_v36  ;;  %v694_v20 = vmul.f32 0.5, %v2537_v59  ;;  %v696_v36 = vmul.f32 0.5, %v2547_v21 }
 0x123   : > { %2040 = verf.f32 %v728_v31  ;;  %v731_v43 = vmul.f32 0.70710677, %v2551_v32  ;;  %v2557_v44 = vadd.f32 %v2408_v56, %v659_v41  ;;  %v816_v50 = vmul.f32 %v784_v42, %v688_v38 }
 0x124   : > { %v2029_v47 = vpop.eup %2028  ;;  %v787_v55 = vadd.f32 1.0, %v2027_v35  ;;  %v695_v31 = vmul.f32 0.5, %v2531_v45 }
 0x125   : > { %2042 = verf.f32 %v731_v43  ;;  %v730_v52 = vmul.f32 0.70710677, %v2557_v44  ;;  %v786_v53 = vadd.f32 1.0, %v2029_v47  ;;  %1891 = vmatprep.mubr.f32.mxu1 %v816_v50  ;;  %v697_v47 = vmul.f32 0.5, %v2541_v7 }
 0x126   : > { %v2031_v60 = vpop.eup %2030  ;;  %1892 = vmatmul.mubr.f32.gmra.mxu1 %v817_v51  ;;  %v819_v5 = vmul.f32 %v787_v55, %v691_v62  ;;  %v698_v51 = vmul.f32 0.5, %v2557_v44 }
 0x127   : > { %2044 = verf.f32 %v730_v52  ;;  %v818_v63 = vmul.f32 %v786_v53, %v690_v49  ;;  %v789_v10 = vadd.f32 1.0, %v2031_v60  ;;  %v699_v60 = vmul.f32 0.5, %v2551_v32 }
 0x128   : > { %v2033_v56 = vpop.eup %2032 }
 0x129   : > { %1894 = vmatprep.mubr.f32.mxu1 %v818_v63  ;;  %v788_v8 = vadd.f32 1.0, %v2033_v56  ;;  %v821_v23 = vmul.f32 %v789_v10, %v693_v14  ;;  %v2573_v56 = vld [vmem:[%s3093_s4] ss:$0 sm:$0xff] }
 0x12a   : > { %v2035_v13 = vpop.eup %2034  ;;  %1895 = vmatmul.mubr.f32.gmra.mxu1 %v819_v5 }
 0x12b   : > { %v820_v16 = vmul.f32 %v788_v8, %v692_v1  ;;  %v791_v28 = vadd.f32 1.0, %v2035_v13 }
 0x12c   : > { %v2037_v19 = vpop.eup %2036 }
 0x12d   : > { %1897 = vmatprep.mubr.f32.mxu1 %v820_v16  ;;  %v790_v25 = vadd.f32 1.0, %v2037_v19  ;;  %v823_v38 = vmul.f32 %v791_v28, %v695_v31 }
 0x12e   : > { %v2039_v29 = vpop.eup %2038  ;;  %1898 = vmatmul.mubr.f32.gmra.mxu1 %v821_v23 }
 0x12f   : > { %v822_v33 = vmul.f32 %v790_v25, %v694_v20  ;;  %v793_v42 = vadd.f32 1.0, %v2039_v29 }
 0x130   : > { %v2041_v35 = vpop.eup %2040 }
 0x131   : > { %1900 = vmatprep.mubr.f32.mxu1 %v822_v33  ;;  %v792_v41 = vadd.f32 1.0, %v2041_v35  ;;  %v825_v52 = vmul.f32 %v793_v42, %v697_v47 }
 0x132   : > { %v2043_v43 = vpop.eup %2042  ;;  %1901 = vmatmul.mubr.f32.gmra.mxu1 %v823_v38 }
 0x133   : > { %v824_v49 = vmul.f32 %v792_v41, %v696_v36  ;;  %v795_v55 = vadd.f32 1.0, %v2043_v43 }
 0x134   : > { %v2045_v50 = vpop.eup %2044 }
 0x135   : > { %1903 = vmatprep.mubr.f32.mxu1 %v824_v49  ;;  %v794_v53 = vadd.f32 1.0, %v2045_v50  ;;  %v827_v63 = vmul.f32 %v795_v55, %v699_v60 }
 0x136   : > { %1904 = vmatmul.mubr.f32.gmra.mxu1 %v825_v52 }
 0x137   : > { %v826_v62 = vmul.f32 %v794_v53, %v698_v51 }
 0x139   : > { %1906 = vmatprep.mubr.f32.mxu1 %v826_v62 }
 0x13a   : > { %1907 = vmatmul.mubr.f32.gmra.mxu1 %v827_v63 }
 0x1be   : > { %v1863_v1 = vpop.f32.mrf.mxu0 }
 0x1bf   : > { %v906_v5 = vadd.f32 %v1863_v1, %v2573_v56 }
 0x1c0   : > { %v900_v8 = vpop.f32.mrf.mxu0 }
 0x1c1   : > { %v901_v10 = vadd.f32 %v2573_v56, %v900_v8  ;;  %v2578_v13 = vadd.f32 %v906_v5, %v2411_v58 }
 0x1c2   : > { %v1866_v14 = vpop.f32.mrf.mxu0 }
 0x1c3   : > { %1093 = vadd.xlane.f32.xlu0 %v2578_v13  ;;  %v916_v16 = vadd.f32 %v1866_v14, %v2573_v56  ;;  %v2583_v20 = vadd.f32 %v901_v10, %v2415_v61 }
 0x1c4   : > { %v910_v19 = vpop.f32.mrf.mxu0 }
 0x1c5   : > { %v911_v23 = vadd.f32 %v2573_v56, %v910_v19  ;;  %v2587_v25 = vadd.f32 %v916_v16, %v2419_v0 }
 0x1c6   : > { %v1869_v28 = vpop.f32.mrf.mxu1 }
 0x1c7   : > { %1091 = vadd.xlane.f32.xlu0 %v2583_v20  ;;  %1097 = vadd.xlane.f32.xlu1 %v2587_v25  ;;  %v926_v29 = vadd.f32 %v1869_v28, %v2573_v56  ;;  %v2594_v33 = vadd.f32 %v911_v23, %v2423_v3 }
 0x1c8   : > { %v920_v58 = vpop.f32.mrf.mxu1 }
 0x1c9   : > { %v921_v31 = vadd.f32 %v2573_v56, %v920_v58  ;;  %v2604_v41 = vadd.f32 %v926_v29, %v2427_v6 }
 0x1ca   : > { %v1872_v61 = vpop.f32.mrf.mxu1 }
 0x1cb   : > { %1095 = vadd.xlane.f32.xlu1 %v2594_v33  ;;  %v2598_v35 = vadd.f32 %v921_v31, %v2431_v9  ;;  %v936_v36 = vadd.f32 %v1872_v61, %v2573_v56 }
 0x1cc   : > { %v930_v0 = vpop.f32.mrf.mxu1 }
 0x1cd   : > { %v931_v38 = vadd.f32 %v2573_v56, %v930_v0  ;;  %1099 = vadd.xlane.f32.xlu0 %v2598_v35  ;;  %v2614_v49 = vadd.f32 %v936_v36, %v2435_v12 }
 0x1ce   : > { %v1875_v42 = vpop.f32.mrf.mxu1 }
 0x1cf   : > { %1101 = vadd.xlane.f32.xlu1 %v2604_v41  ;;  %v2608_v3 = vadd.f32 %v931_v38, %v2439_v15  ;;  %v946_v9 = vadd.f32 %v1875_v42, %v2573_v56 }
 0x1d0   : > { %v940_v43 = vpop.f32.mrf.mxu1 }
 0x1d1   : > { %v941_v47 = vadd.f32 %v2573_v56, %v940_v43  ;;  %1103 = vadd.xlane.f32.xlu0 %v2608_v3  ;;  %v2624_v53 = vadd.f32 %v946_v9, %v2443_v18 }
 0x1d2   : > { %v1878_v50 = vpop.f32.mrf.mxu1 }
 0x1d3   : > { %1105 = vadd.xlane.f32.xlu1 %v2614_v49  ;;  %v2618_v6 = vadd.f32 %v941_v47, %v2447_v24  ;;  %v956_v15 = vadd.f32 %v1878_v50, %v2573_v56 }
 0x1d4   : > { %v950_v51 = vpop.f32.mrf.mxu1 }
 0x1d5   : > { %v951_v52 = vadd.f32 %v2573_v56, %v950_v51  ;;  %1107 = vadd.xlane.f32.xlu0 %v2618_v6  ;;  %v2634_v63 = vadd.f32 %v956_v15, %v2451_v27 }
 0x1d6   : > { %v1881_v55 = vpop.f32.mrf.mxu1 }
 0x1d7   : > { %1109 = vadd.xlane.f32.xlu1 %v2624_v53  ;;  %v2628_v12 = vadd.f32 %v951_v52, %v2457_v34  ;;  %v966_v24 = vadd.f32 %v1881_v55, %v2573_v56 }
 0x1d8   : > { %v960_v60 = vpop.f32.mrf.mxu1 }
 0x1d9   : > { %v961_v62 = vadd.f32 %v2573_v56, %v960_v60  ;;  %1111 = vadd.xlane.f32.xlu0 %v2628_v12  ;;  %v2644_v10 = vadd.f32 %v966_v24, %v2461_v40 }
 0x1da   : > { %v1884_v1 = vpop.f32.mrf.mxu1 }
 0x1db   : > { %1113 = vadd.xlane.f32.xlu1 %v2634_v63  ;;  %v2638_v18 = vadd.f32 %v961_v62, %v2467_v48  ;;  %v976_v34 = vadd.f32 %v1884_v1, %v2573_v56 }
 0x1dc   : > { %v970_v5 = vpop.f32.mrf.mxu1 }
 0x1dd   : > { %v971_v8 = vadd.f32 %v2573_v56, %v970_v5  ;;  %1115 = vadd.xlane.f32.xlu0 %v2638_v18  ;;  %v2654_v23 = vadd.f32 %v976_v34, %v2471_v54 }
 0x1de   : > { %v1887_v14 = vpop.f32.mrf.mxu1 }
 0x1df   : > { %1117 = vadd.xlane.f32.xlu1 %v2644_v10  ;;  %v2648_v27 = vadd.f32 %v971_v8, %v2477_v2  ;;  %v986_v48 = vadd.f32 %v1887_v14, %v2573_v56 }
 0x1e0   : > { %v980_v16 = vpop.f32.mrf.mxu1 }
 0x1e1   : > { %v981_v19 = vadd.f32 %v2573_v56, %v980_v16  ;;  %1119 = vadd.xlane.f32.xlu0 %v2648_v27  ;;  %v2664_v31 = vadd.f32 %v986_v48, %v2481_v11 }
 0x1e2   : > { %v1890_v28 = vpop.f32.mrf.mxu1 }
 0x1e3   : > { %1121 = vadd.xlane.f32.xlu1 %v2654_v23  ;;  %v2658_v40 = vadd.f32 %v981_v19, %v2487_v22  ;;  %v996_v2 = vadd.f32 %v1890_v28, %v2573_v56 }
 0x1e4   : > { %v990_v58 = vpop.f32.mrf.mxu1 }
 0x1e5   : > { %v991_v29 = vadd.f32 %v2573_v56, %v990_v58  ;;  %1123 = vadd.xlane.f32.xlu0 %v2658_v40  ;;  %v2674_v38 = vadd.f32 %v996_v2, %v2491_v30 }
 0x1e6   : > { %v1893_v61 = vpop.f32.mrf.mxu1 }
 0x1e7   : > { %1125 = vadd.xlane.f32.xlu1 %v2664_v31  ;;  %v2668_v54 = vadd.f32 %v991_v29, %v2497_v39  ;;  %v1006_v22 = vadd.f32 %v1893_v61, %v2573_v56 }
 0x1e8   : > { %v1000_v0 = vpop.f32.mrf.mxu1 }
 0x1e9   : > { %v1001_v36 = vadd.f32 %v2573_v56, %v1000_v0  ;;  %1127 = vadd.xlane.f32.xlu0 %v2668_v54  ;;  %v2684_v47 = vadd.f32 %v1006_v22, %v2501_v46 }
 0x1ea   : > { %v1896_v42 = vpop.f32.mrf.mxu1 }
 0x1eb   : > { %1129 = vadd.xlane.f32.xlu1 %v2674_v38  ;;  %v2678_v11 = vadd.f32 %v1001_v36, %v2507_v57  ;;  %v1016_v39 = vadd.f32 %v1896_v42, %v2573_v56 }
 0x1ec   : > { %v1010_v43 = vpop.f32.mrf.mxu1 }
 0x1ed   : > { %v1011_v9 = vadd.f32 %v2573_v56, %v1010_v43  ;;  %1131 = vadd.xlane.f32.xlu0 %v2678_v11  ;;  %v2694_v52 = vadd.f32 %v1016_v39, %v2511_v4 }
 0x1ee   : > { %v1899_v50 = vpop.f32.mrf.mxu1 }
 0x1ef   : > { %1133 = vadd.xlane.f32.xlu1 %v2684_v47  ;;  %v2688_v30 = vadd.f32 %v1011_v9, %v2517_v17  ;;  %v1026_v57 = vadd.f32 %v1899_v50, %v2573_v56 }
 0x1f0   : > { %v1020_v51 = vpop.f32.mrf.mxu1 }
 0x1f1   : > { %v1021_v15 = vadd.f32 %v2573_v56, %v1020_v51  ;;  %1135 = vadd.xlane.f32.xlu0 %v2688_v30  ;;  %v2704_v62 = vadd.f32 %v1026_v57, %v2521_v26 }
 0x1f2   : > { %v1902_v55 = vpop.f32.mrf.mxu1 }
 0x1f3   : > { %1137 = vadd.xlane.f32.xlu1 %v2694_v52  ;;  %v2698_v46 = vadd.f32 %v1021_v15, %v2527_v37  ;;  %v1036_v17 = vadd.f32 %v1902_v55, %v2573_v56 }
 0x1f4   : > { %v1030_v60 = vpop.f32.mrf.mxu1 }
 0x1f5   : > { %v1031_v24 = vadd.f32 %v2573_v56, %v1030_v60  ;;  %1139 = vadd.xlane.f32.xlu0 %v2698_v46  ;;  %v2714_v8 = vadd.f32 %v1036_v17, %v2531_v45 }
 0x1f6   : > { %v1905_v1 = vpop.f32.mrf.mxu1 }
 0x1f7   : > { %1141 = vadd.xlane.f32.xlu1 %v2704_v62  ;;  %v2708_v4 = vadd.f32 %v1031_v24, %v2537_v59  ;;  %v1046_v37 = vadd.f32 %v1905_v1, %v2573_v56 }
 0x1f8   : > { %v1040_v5 = vpop.f32.mrf.mxu1 }
 0x1f9   : > { %v1041_v34 = vadd.f32 %v2573_v56, %v1040_v5  ;;  %1143 = vadd.xlane.f32.xlu0 %v2708_v4  ;;  %v2724_v19 = vadd.f32 %v1046_v37, %v2541_v7 }
 0x1fa   : > { %v1908_v14 = vpop.f32.mrf.mxu1 }
 0x1fb   : > { %1145 = vadd.xlane.f32.xlu1 %v2714_v8  ;;  %v2718_v26 = vadd.f32 %v1041_v34, %v2547_v21  ;;  %v1056_v59 = vadd.f32 %v1908_v14, %v2573_v56 }
 0x1fc   : > { %v1050_v16 = vpop.f32.mrf.mxu1 }
 0x1fd   : > { %v1051_v48 = vadd.f32 %v2573_v56, %v1050_v16  ;;  %1147 = vadd.xlane.f32.xlu0 %v2718_v26  ;;  %v2732_v21 = vadd.f32 %v1056_v59, %v2551_v32 }
 0x1ff   : > { %1149 = vadd.xlane.f32.xlu1 %v2724_v19  ;;  %v2728_v45 = vadd.f32 %v1051_v48, %v2557_v44 }
 0x201   : > { %1151 = vadd.xlane.f32.xlu0 %v2728_v45 }
 0x203   : > { %1153 = vadd.xlane.f32.xlu1 %v2732_v21 }
 0x24c   : > { %v1094_v28 = vpop.xlane.xlu0 %1093 }
 0x24d   : > { %v1157_v58 = vmul.f32 0.0078125, %v1094_v28 }
 0x24f   : > { %v2736_v56 = vsub.f32 %v2578_v13, %v1157_v58 }
 0x250   : > { %v1092_v2 = vpop.xlane.xlu0 %1091  ;;  %v1098_v7 = vpop.xlane.xlu1 %1097 }
 0x251   : > { %v1156_v29 = vmul.f32 0.0078125, %v1092_v2  ;;  %v1221_v61 = vmul.f32 %v2736_v56, %v2736_v56  ;;  %v1159_v44 = vmul.f32 0.0078125, %v1098_v7 }
 0x253   : > { %v2741_v0 = vsub.f32 %v2583_v20, %v1156_v29  ;;  %1254 = vadd.xlane.f32.xlu1 %v1221_v61  ;;  %v2744_v32 = vsub.f32 %v2587_v25, %v1159_v44 }
 0x254   : > { %v1096_v22 = vpop.xlane.xlu1 %1095 }
 0x255   : > { %v1220_v36 = vmul.f32 %v2741_v0, %v2741_v0  ;;  %v1158_v13 = vmul.f32 0.0078125, %v1096_v22  ;;  %v1223_v42 = vmul.f32 %v2744_v32, %v2744_v32 }
 0x256   : > { %v1100_v43 = vpop.xlane.xlu0 %1099 }
 0x257   : > { %1252 = vadd.xlane.f32.xlu0 %v1220_v36  ;;  %v2751_v39 = vsub.f32 %v2594_v33, %v1158_v13  ;;  %v1160_v9 = vmul.f32 0.0078125, %v1100_v43  ;;  %1258 = vadd.xlane.f32.xlu1 %v1223_v42 }
 0x258   : > { %v1102_v20 = vpop.xlane.xlu1 %1101 }
 0x259   : > { %v2754_v50 = vsub.f32 %v2598_v35, %v1160_v9  ;;  %v1161_v25 = vmul.f32 0.0078125, %v1102_v20  ;;  %v1222_v51 = vmul.f32 %v2751_v39, %v2751_v39 }
 0x25a   : > { %v1104_v57 = vpop.xlane.xlu0 %1103 }
 0x25b   : > { %v2759_v15 = vsub.f32 %v2604_v41, %v1161_v25  ;;  %v1162_v55 = vmul.f32 0.0078125, %v1104_v57  ;;  %1256 = vadd.xlane.f32.xlu0 %v1222_v51  ;;  %v1224_v35 = vmul.f32 %v2754_v50, %v2754_v50 }
 0x25c   : > { %v1106_v60 = vpop.xlane.xlu1 %1105 }
 0x25d   : > { %v2762_v33 = vsub.f32 %v2608_v3, %v1162_v55  ;;  %v1163_v17 = vmul.f32 0.0078125, %v1106_v60  ;;  %v1225_v24 = vmul.f32 %v2759_v15, %v2759_v15 }
 0x25e   : > { %v1108_v1 = vpop.xlane.xlu0 %1107 }
 0x25f   : > { %v2769_v5 = vsub.f32 %v2614_v49, %v1163_v17  ;;  %v1164_v37 = vmul.f32 0.0078125, %v1108_v1  ;;  %1262 = vadd.xlane.f32.xlu1 %v1225_v24  ;;  %1260 = vadd.xlane.f32.xlu0 %v1224_v35  ;;  %v1226_v16 = vmul.f32 %v2762_v33, %v2762_v33 }
 0x260   : > { %v1110_v41 = vpop.xlane.xlu1 %1109 }
 0x261   : > { %v2772_v34 = vsub.f32 %v2618_v6, %v1164_v37  ;;  %v1165_v3 = vmul.f32 0.0078125, %v1110_v41  ;;  %v1227_v14 = vmul.f32 %v2769_v5, %v2769_v5 }
 0x262   : > { %v1112_v59 = vpop.xlane.xlu0 %1111 }
 0x263   : > { %v2779_v48 = vsub.f32 %v2624_v53, %v1165_v3  ;;  %v1166_v49 = vmul.f32 0.0078125, %v1112_v59  ;;  %1266 = vadd.xlane.f32.xlu1 %v1227_v14  ;;  %1264 = vadd.xlane.f32.xlu0 %v1226_v16  ;;  %v1228_v7 = vmul.f32 %v2772_v34, %v2772_v34 }
 0x264   : > { %v1114_v28 = vpop.xlane.xlu1 %1113 }
 0x265   : > { %v2782_v58 = vsub.f32 %v2628_v12, %v1166_v49  ;;  %v1167_v6 = vmul.f32 0.0078125, %v1114_v28  ;;  %v1229_v2 = vmul.f32 %v2779_v48, %v2779_v48 }
 0x266   : > { %v1116_v29 = vpop.xlane.xlu0 %1115 }
 0x267   : > { %v2789_v61 = vsub.f32 %v2634_v63, %v1167_v6  ;;  %v1168_v53 = vmul.f32 0.0078125, %v1116_v29  ;;  %1270 = vadd.xlane.f32.xlu1 %v1229_v2  ;;  %1268 = vadd.xlane.f32.xlu0 %v1228_v7  ;;  %v1230_v13 = vmul.f32 %v2782_v58, %v2782_v58 }
 0x268   : > { %v1118_v44 = vpop.xlane.xlu1 %1117 }
 0x269   : > { %v2792_v22 = vsub.f32 %v2638_v18, %v1168_v53  ;;  %v1169_v12 = vmul.f32 0.0078125, %v1118_v44  ;;  %v1231_v36 = vmul.f32 %v2789_v61, %v2789_v61 }
 0x26a   : > { %v1120_v42 = vpop.xlane.xlu0 %1119 }
 0x26b   : > { %v2799_v43 = vsub.f32 %v2644_v10, %v1169_v12  ;;  %v1170_v63 = vmul.f32 0.0078125, %v1120_v42  ;;  %1274 = vadd.xlane.f32.xlu1 %v1231_v36  ;;  %1272 = vadd.xlane.f32.xlu0 %v1230_v13  ;;  %v1232_v51 = vmul.f32 %v2792_v22, %v2792_v22 }
 0x26c   : > { %v1122_v9 = vpop.xlane.xlu1 %1121 }
 0x26d   : > { %v2802_v20 = vsub.f32 %v2648_v27, %v1170_v63  ;;  %v1171_v18 = vmul.f32 0.0078125, %v1122_v9  ;;  %v1233_v25 = vmul.f32 %v2799_v43, %v2799_v43 }
 0x26e   : > { %v1124_v57 = vpop.xlane.xlu0 %1123 }
 0x26f   : > { %v2809_v55 = vsub.f32 %v2654_v23, %v1171_v18  ;;  %v1172_v10 = vmul.f32 0.0078125, %v1124_v57  ;;  %1278 = vadd.xlane.f32.xlu1 %v1233_v25  ;;  %1276 = vadd.xlane.f32.xlu0 %v1232_v51  ;;  %v1234_v35 = vmul.f32 %v2802_v20, %v2802_v20 }
 0x270   : > { %v1126_v60 = vpop.xlane.xlu1 %1125 }
 0x271   : > { %v2812_v17 = vsub.f32 %v2658_v40, %v1172_v10  ;;  %v1173_v27 = vmul.f32 0.0078125, %v1126_v60  ;;  %v1235_v24 = vmul.f32 %v2809_v55, %v2809_v55 }
 0x272   : > { %v1128_v1 = vpop.xlane.xlu0 %1127 }
 0x273   : > { %v2819_v37 = vsub.f32 %v2664_v31, %v1173_v27  ;;  %v1174_v23 = vmul.f32 0.0078125, %v1128_v1  ;;  %1282 = vadd.xlane.f32.xlu1 %v1235_v24  ;;  %1280 = vadd.xlane.f32.xlu0 %v1234_v35  ;;  %v1236_v16 = vmul.f32 %v2812_v17, %v2812_v17 }
 0x274   : > { %v1130_v41 = vpop.xlane.xlu1 %1129 }
 0x275   : > { %v2822_v3 = vsub.f32 %v2668_v54, %v1174_v23  ;;  %v1175_v40 = vmul.f32 0.0078125, %v1130_v41  ;;  %v1237_v14 = vmul.f32 %v2819_v37, %v2819_v37 }
 0x276   : > { %v1132_v59 = vpop.xlane.xlu0 %1131 }
 0x277   : > { %v2829_v49 = vsub.f32 %v2674_v38, %v1175_v40  ;;  %v1176_v31 = vmul.f32 0.0078125, %v1132_v59  ;;  %1286 = vadd.xlane.f32.xlu1 %v1237_v14  ;;  %1284 = vadd.xlane.f32.xlu0 %v1236_v16  ;;  %v1238_v7 = vmul.f32 %v2822_v3, %v2822_v3 }
 0x278   : > { %v1134_v28 = vpop.xlane.xlu1 %1133 }
 0x279   : > { %v2832_v6 = vsub.f32 %v2678_v11, %v1176_v31  ;;  %v1177_v54 = vmul.f32 0.0078125, %v1134_v28  ;;  %v1239_v2 = vmul.f32 %v2829_v49, %v2829_v49 }
 0x27a   : > { %v1136_v29 = vpop.xlane.xlu0 %1135 }
 0x27b   : > { %v2839_v53 = vsub.f32 %v2684_v47, %v1177_v54  ;;  %v1178_v38 = vmul.f32 0.0078125, %v1136_v29  ;;  %1290 = vadd.xlane.f32.xlu1 %v1239_v2  ;;  %1288 = vadd.xlane.f32.xlu0 %v1238_v7  ;;  %v1240_v13 = vmul.f32 %v2832_v6, %v2832_v6 }
 0x27c   : > { %v1138_v44 = vpop.xlane.xlu1 %1137 }
 0x27d   : > { %v2842_v12 = vsub.f32 %v2688_v30, %v1178_v38  ;;  %v1179_v11 = vmul.f32 0.0078125, %v1138_v44  ;;  %v1241_v36 = vmul.f32 %v2839_v53, %v2839_v53 }
 0x27e   : > { %v1140_v42 = vpop.xlane.xlu0 %1139 }
 0x27f   : > { %v2849_v63 = vsub.f32 %v2694_v52, %v1179_v11  ;;  %v1180_v47 = vmul.f32 0.0078125, %v1140_v42  ;;  %1294 = vadd.xlane.f32.xlu1 %v1241_v36  ;;  %1292 = vadd.xlane.f32.xlu0 %v1240_v13  ;;  %v1242_v51 = vmul.f32 %v2842_v12, %v2842_v12 }
 0x280   : > { %v1142_v9 = vpop.xlane.xlu1 %1141 }
 0x281   : > { %v2852_v18 = vsub.f32 %v2698_v46, %v1180_v47  ;;  %v1181_v30 = vmul.f32 0.0078125, %v1142_v9  ;;  %v1243_v25 = vmul.f32 %v2849_v63, %v2849_v63 }
 0x282   : > { %v1144_v57 = vpop.xlane.xlu0 %1143 }
 0x283   : > { %v2859_v10 = vsub.f32 %v2704_v62, %v1181_v30  ;;  %v1182_v52 = vmul.f32 0.0078125, %v1144_v57  ;;  %1298 = vadd.xlane.f32.xlu1 %v1243_v25  ;;  %1296 = vadd.xlane.f32.xlu0 %v1242_v51  ;;  %v1244_v35 = vmul.f32 %v2852_v18, %v2852_v18 }
 0x284   : > { %v1146_v60 = vpop.xlane.xlu1 %1145 }
 0x285   : > { %v2862_v27 = vsub.f32 %v2708_v4, %v1182_v52  ;;  %v1183_v46 = vmul.f32 0.0078125, %v1146_v60  ;;  %v1245_v24 = vmul.f32 %v2859_v10, %v2859_v10 }
 0x286   : > { %v1148_v1 = vpop.xlane.xlu0 %1147 }
 0x287   : > { %v2869_v23 = vsub.f32 %v2714_v8, %v1183_v46  ;;  %v1184_v62 = vmul.f32 0.0078125, %v1148_v1  ;;  %1302 = vadd.xlane.f32.xlu1 %v1245_v24  ;;  %1300 = vadd.xlane.f32.xlu0 %v1244_v35  ;;  %v1246_v16 = vmul.f32 %v2862_v27, %v2862_v27 }
 0x288   : > { %v1150_v41 = vpop.xlane.xlu1 %1149 }
 0x289   : > { %v2872_v40 = vsub.f32 %v2718_v26, %v1184_v62  ;;  %v1185_v4 = vmul.f32 0.0078125, %v1150_v41  ;;  %v1247_v14 = vmul.f32 %v2869_v23, %v2869_v23 }
 0x28a   : > { %v1152_v59 = vpop.xlane.xlu0 %1151 }
 0x28b   : > { %v2879_v31 = vsub.f32 %v2724_v19, %v1185_v4  ;;  %v1186_v8 = vmul.f32 0.0078125, %v1152_v59  ;;  %1306 = vadd.xlane.f32.xlu1 %v1247_v14  ;;  %1304 = vadd.xlane.f32.xlu0 %v1246_v16  ;;  %v1248_v7 = vmul.f32 %v2872_v40, %v2872_v40  ;;  %v2899_v4 = vld [vmem:[%s3094_s5] ss:$0 sm:$0xff] }
 0x28c   : > { %v1154_v28 = vpop.xlane.xlu1 %1153 }
 0x28d   : > { %v2882_v54 = vsub.f32 %v2728_v45, %v1186_v8  ;;  %v1187_v26 = vmul.f32 0.0078125, %v1154_v28  ;;  %v1249_v2 = vmul.f32 %v2879_v31, %v2879_v31  ;;  %v2907_v8 = vld [vmem:[%s3095_s6] ss:$0 sm:$0xff] }
 0x28f   : > { %v2889_v29 = vsub.f32 %v2732_v21, %v1187_v26  ;;  %1310 = vadd.xlane.f32.xlu1 %v1249_v2  ;;  %1308 = vadd.xlane.f32.xlu0 %v1248_v7  ;;  %v1250_v38 = vmul.f32 %v2882_v54, %v2882_v54 }
 0x291   : > { %v1251_v19 = vmul.f32 %v2889_v29, %v2889_v29 }
 0x293   : > { %1314 = vadd.xlane.f32.xlu1 %v1251_v19  ;;  %1312 = vadd.xlane.f32.xlu0 %v1250_v38 }
 0x2dc   : > { %v1255_v45 = vpop.xlane.xlu1 %1254 }
 0x2dd   : > { %v1317_v44 = vmul.f32 0.0078125, %v1255_v45 }
 0x2df   : > { %v1349_v11 = vadd.f32 1e-05, %v1317_v44 }
 0x2e0   : > { %v1253_v36 = vpop.xlane.xlu0 %1252  ;;  %v1259_v13 = vpop.xlane.xlu1 %1258 }
 0x2e1   : > { %2046 = vrsqrt.f32 %v1349_v11  ;;  %v1316_v42 = vmul.f32 0.0078125, %v1253_v36  ;;  %v1319_v21 = vmul.f32 0.0078125, %v1259_v13 }
 0x2e3   : > { %v1348_v47 = vadd.f32 1e-05, %v1316_v42  ;;  %v1351_v9 = vadd.f32 1e-05, %v1319_v21 }
 0x2e4   : > { %v1257_v30 = vpop.xlane.xlu0 %1256 }
 0x2e5   : > { %2048 = vrsqrt.f32 %v1348_v47  ;;  %v1318_v25 = vmul.f32 0.0078125, %v1257_v30 }
 0x2e6   : > { %2050 = vrsqrt.f32 %v1351_v9 }
 0x2e7   : > { %v1350_v51 = vadd.f32 1e-05, %v1318_v25 }
 0x2e8   : > { %v1263_v57 = vpop.xlane.xlu1 %1262  ;;  %v1261_v52 = vpop.xlane.xlu0 %1260 }
 0x2e9   : > { %2052 = vrsqrt.f32 %v1350_v51  ;;  %v1321_v60 = vmul.f32 0.0078125, %v1263_v57  ;;  %v1320_v46 = vmul.f32 0.0078125, %v1261_v52 }
 0x2eb   : > { %v1353_v24 = vadd.f32 1e-05, %v1321_v60  ;;  %v1352_v35 = vadd.f32 1e-05, %v1320_v46 }
 0x2ec   : > { %v1267_v1 = vpop.xlane.xlu1 %1266  ;;  %v1265_v62 = vpop.xlane.xlu0 %1264 }
 0x2ed   : > { %2054 = vrsqrt.f32 %v1353_v24  ;;  %v1323_v14 = vmul.f32 0.0078125, %v1267_v1  ;;  %v1322_v16 = vmul.f32 0.0078125, %v1265_v62 }
 0x2ee   : > { %v2047_v41 = vpop.eup %2046  ;;  %2056 = vrsqrt.f32 %v1352_v35 }
 0x2ef   : > { %v1413_v59 = vmul.f32 %v2047_v41, %v2736_v56  ;;  %v1355_v28 = vadd.f32 1e-05, %v1323_v14  ;;  %v1354_v26 = vadd.f32 1e-05, %v1322_v16 }
 0x2f0   : > { %v1271_v7 = vpop.xlane.xlu1 %1270  ;;  %v1269_v19 = vpop.xlane.xlu0 %1268 }
 0x2f1   : > { %v1451_v2 = vmul.f32 %v2899_v4, %v1413_v59  ;;  %2058 = vrsqrt.f32 %v1355_v28  ;;  %v1325_v45 = vmul.f32 0.0078125, %v1271_v7  ;;  %v1324_v44 = vmul.f32 0.0078125, %v1269_v19 }
 0x2f2   : > { %v2049_v38 = vpop.eup %2048  ;;  %2060 = vrsqrt.f32 %v1354_v26 }
 0x2f3   : > { %v2051_v11 = vpop.eup %2050  ;;  %v1489_v36 = vadd.f32 %v2907_v8, %v1451_v2  ;;  %v1412_v56 = vmul.f32 %v2049_v38, %v2741_v0  ;;  %v1357_v42 = vadd.f32 1e-05, %v1325_v45  ;;  %v1356_v21 = vadd.f32 1e-05, %v1324_v44 }
 0x2f4   : > { %v1415_v13 = vmul.f32 %v2051_v11, %v2744_v32  ;;  %v1275_v9 = vpop.xlane.xlu1 %1274  ;;  %v1273_v30 = vpop.xlane.xlu0 %1272 }
 0x2f5   : > { %1521 = vst [vmem:[%s2913_s21 + $0x8] sm:$0xff] %v1489_v36  ;;  %v1450_v47 = vmul.f32 %v2899_v4, %v1412_v56  ;;  %2062 = vrsqrt.f32 %v1357_v42  ;;  %v1327_v51 = vmul.f32 0.0078125, %v1275_v9  ;;  %v1326_v0 = vmul.f32 0.0078125, %v1273_v30 }
 0x2f6   : > { %v1453_v25 = vmul.f32 %v2899_v4, %v1415_v13  ;;  %v2053_v57 = vpop.eup %2052  ;;  %2064 = vrsqrt.f32 %v1356_v21 }
 0x2f7   : > { %v1488_v32 = vadd.f32 %v2907_v8, %v1450_v47  ;;  %v1414_v60 = vmul.f32 %v2053_v57, %v2751_v39  ;;  %v1359_v46 = vadd.f32 1e-05, %v1327_v51  ;;  %v1358_v24 = vadd.f32 1e-05, %v1326_v0 }
 0x2f8   : > { %v1491_v52 = vadd.f32 %v2907_v8, %v1453_v25  ;;  %v1279_v35 = vpop.xlane.xlu1 %1278  ;;  %v1277_v1 = vpop.xlane.xlu0 %1276 }
 0x2f9   : > { %1520 = vst [vmem:[%s2913_s21] sm:$0xff] %v1488_v32  ;;  %v1452_v62 = vmul.f32 %v2899_v4, %v1414_v60  ;;  %2066 = vrsqrt.f32 %v1359_v46  ;;  %v1329_v41 = vmul.f32 0.0078125, %v1279_v35  ;;  %v1328_v14 = vmul.f32 0.0078125, %v1277_v1 }
 0x2fa   : > { %1523 = vst [vmem:[%s2913_s21 + $0x18] sm:$0xff] %v1491_v52  ;;  %v2055_v16 = vpop.eup %2054  ;;  %2068 = vrsqrt.f32 %v1358_v24 }
 0x2fb   : > { %v2057_v59 = vpop.eup %2056  ;;  %v1490_v28 = vadd.f32 %v2907_v8, %v1452_v62  ;;  %v1417_v26 = vmul.f32 %v2055_v16, %v2759_v15  ;;  %v1361_v39 = vadd.f32 1e-05, %v1329_v41  ;;  %v1360_v2 = vadd.f32 1e-05, %v1328_v14 }
 0x2fc   : > { %v1416_v7 = vmul.f32 %v2057_v59, %v2754_v50  ;;  %v1283_v19 = vpop.xlane.xlu1 %1282  ;;  %v1281_v38 = vpop.xlane.xlu0 %1280 }
 0x2fd   : > { %1522 = vst [vmem:[%s2913_s21 + $0x10] sm:$0xff] %v1490_v28  ;;  %v1455_v45 = vmul.f32 %v2899_v4, %v1417_v26  ;;  %2070 = vrsqrt.f32 %v1361_v39  ;;  %v1331_v44 = vmul.f32 0.0078125, %v1283_v19  ;;  %v1330_v11 = vmul.f32 0.0078125, %v1281_v38 }
 0x2fe   : > { %v2059_v36 = vpop.eup %2058  ;;  %v1454_v56 = vmul.f32 %v2899_v4, %v1416_v7  ;;  %2072 = vrsqrt.f32 %v1360_v2 }
 0x2ff   : > { %v2061_v13 = vpop.eup %2060  ;;  %v1493_v15 = vadd.f32 %v2907_v8, %v1455_v45  ;;  %v1419_v42 = vmul.f32 %v2059_v36, %v2769_v5  ;;  %v1363_v50 = vadd.f32 1e-05, %v1331_v44  ;;  %v1362_v21 = vadd.f32 1e-05, %v1330_v11 }
 0x300   : > { %v1492_v47 = vadd.f32 %v2907_v8, %v1454_v56  ;;  %v1418_v9 = vmul.f32 %v2061_v13, %v2762_v33  ;;  %v1287_v30 = vpop.xlane.xlu1 %1286  ;;  %v1285_v25 = vpop.xlane.xlu0 %1284 }
 0x301   : > { %1525 = vst [vmem:[%s2913_s21 + $0x28] sm:$0xff] %v1493_v15  ;;  %v1457_v51 = vmul.f32 %v2899_v4, %v1419_v42  ;;  %2074 = vrsqrt.f32 %v1363_v50  ;;  %v1333_v0 = vmul.f32 0.0078125, %v1287_v30  ;;  %v1332_v57 = vmul.f32 0.0078125, %v1285_v25 }
 0x302   : > { %v2063_v32 = vpop.eup %2062  ;;  %1524 = vst [vmem:[%s2913_s21 + $0x20] sm:$0xff] %v1492_v47  ;;  %v1456_v52 = vmul.f32 %v2899_v4, %v1418_v9  ;;  %2076 = vrsqrt.f32 %v1362_v21 }
 0x303   : > { %v2065_v5 = vpop.eup %2064  ;;  %v1495_v60 = vadd.f32 %v2907_v8, %v1457_v51  ;;  %v1421_v33 = vmul.f32 %v2063_v32, %v2779_v48  ;;  %v1365_v46 = vadd.f32 1e-05, %v1333_v0  ;;  %v1364_v24 = vadd.f32 1e-05, %v1332_v57 }
 0x304   : > { %v1494_v35 = vadd.f32 %v2907_v8, %v1456_v52  ;;  %v1420_v1 = vmul.f32 %v2065_v5, %v2772_v34  ;;  %v1291_v62 = vpop.xlane.xlu1 %1290  ;;  %v1289_v41 = vpop.xlane.xlu0 %1288 }
 0x305   : > { %1527 = vst [vmem:[%s2913_s21 + $0x38] sm:$0xff] %v1495_v60  ;;  %v1459_v14 = vmul.f32 %v2899_v4, %v1421_v33  ;;  %2078 = vrsqrt.f32 %v1365_v46  ;;  %v1335_v16 = vmul.f32 0.0078125, %v1291_v62  ;;  %v1334_v59 = vmul.f32 0.0078125, %v1289_v41 }
 0x306   : > { %v2067_v28 = vpop.eup %2066  ;;  %1526 = vst [vmem:[%s2913_s21 + $0x30] sm:$0xff] %v1494_v35  ;;  %v1458_v26 = vmul.f32 %v2899_v4, %v1420_v1  ;;  %2080 = vrsqrt.f32 %v1364_v24 }
 0x307   : > { %v2069_v48 = vpop.eup %2068  ;;  %v1497_v39 = vadd.f32 %v2907_v8, %v1459_v14  ;;  %v1423_v34 = vmul.f32 %v2067_v28, %v2789_v61  ;;  %v1367_v2 = vadd.f32 1e-05, %v1335_v16  ;;  %v1366_v7 = vadd.f32 1e-05, %v1334_v59 }
 0x308   : > { %v1496_v19 = vadd.f32 %v2907_v8, %v1458_v26  ;;  %v1422_v38 = vmul.f32 %v2069_v48, %v2782_v58  ;;  %v1295_v45 = vpop.xlane.xlu1 %1294  ;;  %v1293_v44 = vpop.xlane.xlu0 %1292 }
 0x309   : > { %1529 = vst [vmem:[%s2913_s21 + $0x48] sm:$0xff] %v1497_v39  ;;  %v1461_v11 = vmul.f32 %v2899_v4, %v1423_v34  ;;  %2082 = vrsqrt.f32 %v1367_v2  ;;  %v1337_v36 = vmul.f32 0.0078125, %v1295_v45  ;;  %v1336_v56 = vmul.f32 0.0078125, %v1293_v44 }
 0x30a   : > { %v2071_v13 = vpop.eup %2070  ;;  %1528 = vst [vmem:[%s2913_s21 + $0x40] sm:$0xff] %v1496_v19  ;;  %v1460_v15 = vmul.f32 %v2899_v4, %v1422_v38  ;;  %2084 = vrsqrt.f32 %v1366_v7 }
 0x30b   : > { %v2073_v61 = vpop.eup %2072  ;;  %v1499_v42 = vadd.f32 %v2907_v8, %v1461_v11  ;;  %v1425_v58 = vmul.f32 %v2071_v13, %v2799_v43  ;;  %v1369_v50 = vadd.f32 1e-05, %v1337_v36  ;;  %v1368_v21 = vadd.f32 1e-05, %v1336_v56 }
 0x30c   : > { %v1498_v47 = vadd.f32 %v2907_v8, %v1460_v15  ;;  %v1424_v9 = vmul.f32 %v2073_v61, %v2792_v22  ;;  %v1299_v30 = vpop.xlane.xlu1 %1298  ;;  %v1297_v25 = vpop.xlane.xlu0 %1296 }
 0x30d   : > { %1531 = vst [vmem:[%s2913_s21 + $0x58] sm:$0xff] %v1499_v42  ;;  %v1463_v51 = vmul.f32 %v2899_v4, %v1425_v58  ;;  %2086 = vrsqrt.f32 %v1369_v50  ;;  %v1339_v0 = vmul.f32 0.0078125, %v1299_v30  ;;  %v1338_v57 = vmul.f32 0.0078125, %v1297_v25 }
 0x30e   : > { %v2075_v32 = vpop.eup %2074  ;;  %1530 = vst [vmem:[%s2913_s21 + $0x50] sm:$0xff] %v1498_v47  ;;  %v1462_v52 = vmul.f32 %v2899_v4, %v1424_v9  ;;  %2088 = vrsqrt.f32 %v1368_v21 }
 0x30f   : > { %v2077_v43 = vpop.eup %2076  ;;  %v1501_v5 = vadd.f32 %v2907_v8, %v1463_v51  ;;  %v1427_v22 = vmul.f32 %v2075_v32, %v2809_v55  ;;  %v1371_v60 = vadd.f32 1e-05, %v1339_v0  ;;  %v1370_v33 = vadd.f32 1e-05, %v1338_v57 }
 0x310   : > { %v1500_v46 = vadd.f32 %v2907_v8, %v1462_v52  ;;  %v1426_v24 = vmul.f32 %v2077_v43, %v2802_v20  ;;  %v1303_v35 = vpop.xlane.xlu1 %1302  ;;  %v1301_v1 = vpop.xlane.xlu0 %1300 }
 0x311   : > { %1533 = vst [vmem:[%s2913_s21 + $0x68] sm:$0xff] %v1501_v5  ;;  %v1465_v62 = vmul.f32 %v2899_v4, %v1427_v22  ;;  %2090 = vrsqrt.f32 %v1371_v60  ;;  %v1341_v41 = vmul.f32 0.0078125, %v1303_v35  ;;  %v1340_v14 = vmul.f32 0.0078125, %v1301_v1 }
 0x312   : > { %v2079_v16 = vpop.eup %2078  ;;  %1532 = vst [vmem:[%s2913_s21 + $0x60] sm:$0xff] %v1500_v46  ;;  %v1464_v59 = vmul.f32 %v2899_v4, %v1426_v24  ;;  %2092 = vrsqrt.f32 %v1370_v33 }
 0x313   : > { %v2081_v55 = vpop.eup %2080  ;;  %v1503_v28 = vadd.f32 %v2907_v8, %v1465_v62  ;;  %v1429_v20 = vmul.f32 %v2079_v16, %v2819_v37  ;;  %v1373_v26 = vadd.f32 1e-05, %v1341_v41  ;;  %v1372_v48 = vadd.f32 1e-05, %v1340_v14 }
 0x314   : > { %v1502_v39 = vadd.f32 %v2907_v8, %v1464_v59  ;;  %v1428_v34 = vmul.f32 %v2081_v55, %v2812_v17  ;;  %v1307_v2 = vpop.xlane.xlu1 %1306  ;;  %v1305_v7 = vpop.xlane.xlu0 %1304 }
 0x315   : > { %1535 = vst [vmem:[%s2913_s21 + $0x78] sm:$0xff] %v1503_v28  ;;  %v1467_v19 = vmul.f32 %v2899_v4, %v1429_v20  ;;  %2094 = vrsqrt.f32 %v1373_v26  ;;  %v1343_v38 = vmul.f32 0.0078125, %v1307_v2  ;;  %v1342_v45 = vmul.f32 0.0078125, %v1305_v7 }
 0x316   : > { %v2083_v44 = vpop.eup %2082  ;;  %1534 = vst [vmem:[%s2913_s21 + $0x70] sm:$0xff] %v1502_v39  ;;  %v1466_v11 = vmul.f32 %v2899_v4, %v1428_v34  ;;  %2096 = vrsqrt.f32 %v1372_v48 }
 0x317   : > { %v2085_v37 = vpop.eup %2084  ;;  %v1505_v36 = vadd.f32 %v2907_v8, %v1467_v19  ;;  %v1431_v17 = vmul.f32 %v2083_v44, %v2829_v49  ;;  %v1375_v56 = vadd.f32 1e-05, %v1343_v38  ;;  %v1374_v13 = vadd.f32 1e-05, %v1342_v45 }
 0x318   : > { %v1504_v15 = vadd.f32 %v2907_v8, %v1466_v11  ;;  %v1430_v61 = vmul.f32 %v2085_v37, %v2822_v3  ;;  %v1311_v42 = vpop.xlane.xlu1 %1310  ;;  %v1309_v58 = vpop.xlane.xlu0 %1308 }
 0x319   : > { %1537 = vst [vmem:[%s2913_s21 + $0x88] sm:$0xff] %v1505_v36  ;;  %v1469_v50 = vmul.f32 %v2899_v4, %v1431_v17  ;;  %2098 = vrsqrt.f32 %v1375_v56  ;;  %v1345_v21 = vmul.f32 0.0078125, %v1311_v42  ;;  %v1344_v47 = vmul.f32 0.0078125, %v1309_v58 }
 0x31a   : > { %v2087_v9 = vpop.eup %2086  ;;  %1536 = vst [vmem:[%s2913_s21 + $0x80] sm:$0xff] %v1504_v15  ;;  %v1468_v30 = vmul.f32 %v2899_v4, %v1430_v61  ;;  %2100 = vrsqrt.f32 %v1374_v13 }
 0x31b   : > { %v2089_v49 = vpop.eup %2088  ;;  %v1507_v25 = vadd.f32 %v2907_v8, %v1469_v50  ;;  %v1433_v3 = vmul.f32 %v2087_v9, %v2839_v53  ;;  %v1377_v51 = vadd.f32 1e-05, %v1345_v21  ;;  %v1376_v0 = vadd.f32 1e-05, %v1344_v47 }
 0x31c   : > { %v1506_v57 = vadd.f32 %v2907_v8, %v1468_v30  ;;  %v1432_v32 = vmul.f32 %v2089_v49, %v2832_v6  ;;  %v1315_v52 = vpop.xlane.xlu1 %1314  ;;  %v1313_v43 = vpop.xlane.xlu0 %1312 }
 0x31d   : > { %1539 = vst [vmem:[%s2913_s21 + $0x98] sm:$0xff] %v1507_v25  ;;  %v1471_v5 = vmul.f32 %v2899_v4, %v1433_v3  ;;  %2102 = vrsqrt.f32 %v1377_v51  ;;  %v1347_v22 = vmul.f32 0.0078125, %v1315_v52  ;;  %v1346_v60 = vmul.f32 0.0078125, %v1313_v43 }
 0x31e   : > { %v2091_v33 = vpop.eup %2090  ;;  %1538 = vst [vmem:[%s2913_s21 + $0x90] sm:$0xff] %v1506_v57  ;;  %v1470_v53 = vmul.f32 %v2899_v4, %v1432_v32  ;;  %2104 = vrsqrt.f32 %v1376_v0 }
 0x31f   : > { %v2093_v46 = vpop.eup %2092  ;;  %v1509_v24 = vadd.f32 %v2907_v8, %v1471_v5  ;;  %v1435_v6 = vmul.f32 %v2091_v33, %v2849_v63  ;;  %v1379_v35 = vadd.f32 1e-05, %v1347_v22  ;;  %v1378_v1 = vadd.f32 1e-05, %v1346_v60 }
 0x320   : > { %v1508_v62 = vadd.f32 %v2907_v8, %v1470_v53  ;;  %v1434_v41 = vmul.f32 %v2093_v46, %v2842_v12 }
 0x321   : > { %1541 = vst [vmem:[%s2913_s21 + $0xa8] sm:$0xff] %v1509_v24  ;;  %v1473_v14 = vmul.f32 %v2899_v4, %v1435_v6  ;;  %2106 = vrsqrt.f32 %v1379_v35 }
 0x322   : > { %v2095_v16 = vpop.eup %2094  ;;  %1540 = vst [vmem:[%s2913_s21 + $0xa0] sm:$0xff] %v1508_v62  ;;  %v1472_v59 = vmul.f32 %v2899_v4, %v1434_v41  ;;  %2108 = vrsqrt.f32 %v1378_v1 }
 0x323   : > { %v2097_v55 = vpop.eup %2096  ;;  %v1511_v63 = vadd.f32 %v2907_v8, %v1473_v14  ;;  %v1437_v28 = vmul.f32 %v2095_v16, %v2859_v10 }
 0x324   : > { %v1510_v20 = vadd.f32 %v2907_v8, %v1472_v59  ;;  %v1436_v12 = vmul.f32 %v2097_v55, %v2852_v18 }
 0x325   : > { %1543 = vst [vmem:[%s2913_s21 + $0xb8] sm:$0xff] %v1511_v63  ;;  %v1475_v26 = vmul.f32 %v2899_v4, %v1437_v28 }
 0x326   : > { %v2099_v48 = vpop.eup %2098  ;;  %1542 = vst [vmem:[%s2913_s21 + $0xb0] sm:$0xff] %v1510_v20  ;;  %v1474_v39 = vmul.f32 %v2899_v4, %v1436_v12 }
 0x327   : > { %v2101_v34 = vpop.eup %2100  ;;  %v1513_v2 = vadd.f32 %v2907_v8, %v1475_v26  ;;  %v1439_v7 = vmul.f32 %v2099_v48, %v2869_v23 }
 0x328   : > { %v1512_v10 = vadd.f32 %v2907_v8, %v1474_v39  ;;  %v1438_v19 = vmul.f32 %v2101_v34, %v2862_v27 }
 0x329   : > { %1545 = vst [vmem:[%s2913_s21 + $0xc8] sm:$0xff] %v1513_v2  ;;  %v1477_v18 = vmul.f32 %v2899_v4, %v1439_v7 }
 0x32a   : > { %v2103_v38 = vpop.eup %2102  ;;  %1544 = vst [vmem:[%s2913_s21 + $0xc0] sm:$0xff] %v1512_v10  ;;  %v1476_v45 = vmul.f32 %v2899_v4, %v1438_v19 }
 0x32b   : > { %v2105_v44 = vpop.eup %2104  ;;  %v1515_v11 = vadd.f32 %v2907_v8, %v1477_v18  ;;  %v1441_v23 = vmul.f32 %v2103_v38, %v2879_v31 }
 0x32c   : > { %v1514_v37 = vadd.f32 %v2907_v8, %v1476_v45  ;;  %v1440_v27 = vmul.f32 %v2105_v44, %v2872_v40 }
 0x32d   : > { %1547 = vst [vmem:[%s2913_s21 + $0xd8] sm:$0xff] %v1515_v11  ;;  %v1479_v36 = vmul.f32 %v2899_v4, %v1441_v23 }
 0x32e   : > { %v2107_v17 = vpop.eup %2106  ;;  %1546 = vst [vmem:[%s2913_s21 + $0xd0] sm:$0xff] %v1514_v37  ;;  %v1478_v56 = vmul.f32 %v2899_v4, %v1440_v27 }
 0x32f   : > { %v2109_v13 = vpop.eup %2108  ;;  %v1517_v15 = vadd.f32 %v2907_v8, %v1479_v36  ;;  %v1443_v31 = vmul.f32 %v2107_v17, %v2889_v29 }
 0x330   : > { %v1516_v61 = vadd.f32 %v2907_v8, %v1478_v56  ;;  %v1442_v42 = vmul.f32 %v2109_v13, %v2882_v54 }
 0x331   : > { %1549 = vst [vmem:[%s2913_s21 + $0xe8] sm:$0xff] %v1517_v15  ;;  %v1481_v40 = vmul.f32 %v2899_v4, %v1443_v31 }
 0x332   : > { %1548 = vst [vmem:[%s2913_s21 + $0xe0] sm:$0xff] %v1516_v61  ;;  %v1480_v58 = vmul.f32 %v2899_v4, %v1442_v42 }
 0x333   : > { %v1519_v50 = vadd.f32 %v2907_v8, %v1481_v40 }
 0x334   : > { %v1518_v54 = vadd.f32 %v2907_v8, %v1480_v58 }
 0x335   : > { %1551 = vst [vmem:[%s2913_s21 + $0xf8] sm:$0xff] %v1519_v50 }
 0x336   : > { %1550 = vst [vmem:[%s2913_s21 + $0xf0] sm:$0xff] %v1518_v54 }
 0x337   : > { %2123 = shalt.err (!%p2120_p3)
}
 0x338   : > { %s2124_s15 = scalar_lea.hbm %s3040_s9, 4096  ;;  %s2128_s17 = scalar_lea.hbm %s3096_s7, 16384 }
 0x339   : > { %p2125_p4 = scmp.ne.s32.totalorder %s3040_s9, %s2124_s15  ;;  %p2129_p9 = scmp.lt.s32.totalorder %s3040_s9, %s3096_s7 }
 0x33a   : > { %p2130_p10 = scmp.lt.s32.totalorder %s2128_s17, %s2124_s15 }
 0x33b   : > { %p2126_p7 = pnand %p2125_p4, %p2253_p5 }
 0x33c   : > { %p2131_p11 = por %p2130_p10, %p2129_p9 }
 0x33d   : > { %p2127_p8 = pneg %p2126_p7 }
 0x33f   : > { %p2132_p12 = pnand %p2131_p11, %p2127_p8 }
 0x341   : > { %2135 = shalt.err (!%p2132_p12)
}
 0x342   : > { %s2173_s29 = smov 128   ;;  %s2174_s8 = smov 8  }
 0x343   : > { %1941 = dma.vmem_to_hbm [thread:$0]  (%p2253_p5), %s3042_s23, 4096, %s3040_s9, %s3049_s28, %s2173_s29, %s2173_s29, %s2174_s8  }
 0x344 PF: > { %p1947_p13 = scmp.ge.s32.totalorder %s2170_s27, 2  ;;  %s1581_s13 = sand.u32 1, %s2158_s24  }
 0x345   : > { %s1582_s14 = scalar_lea.sflag [#allocation3], %s1581_s13 }
 0x346   : > { %p1944_p0 = pnand %p1947_p13, %p2257_p6 }
 0x348   : > { %p1945_p1 = pneg %p1944_p0 }
 0x34a   : > { %2153 = dma.done.wait (%p1945_p1), %s1582_s14, 4096  }
 0x34b   : > { %2155 = vsyncadd (%p1945_p1), %s1582_s14, 4294963200  ;;  %p17_p2 = scmp.ge.s32.totalorder %s2240_s30, 6   ;;  %s3099_s24 = smov %s2162_s25 }
 0x34c   : > { %s3100_s25 = smov %s2166_s26  ;;  %s3101_s26 = smov %s2251_s10 }
 0x34d   : > { %s3102_s27 = smov %s2240_s30  ;;  %19 = sbr.rel (!%p17_p2) target bundleno = 3 (0x3), region = 83 }
 0x352   :  { %1587 = vsyncpa [#allocation3], 1 }
 0x353   :  { %1589 = vsyncpa [#allocation3 + $0x1], 1 }

</bundles_post_ra>
